<compile_context>
chip_gen: v5e
topology: v5e:2x2
jax: 0.10.0
libtpu: 0.0.40
codegen_flags: <defaults>
</compile_context>

<pallas_src>
import jax
import jax.numpy as jnp
from jax import lax
from jax.experimental import pallas as pl
from jax.experimental.pallas import tpu as pltpu

GAMMA_RELU = 1.7139588594436646   # _nonlin_gamma['relu']
ALPHA = 0.2
BETA = 1.0
EPS = 1e-5                        # ScaledStdConv2d eps (use_layernorm=False)


def _standardize_weight(w, gain):
    """ScaledStdConv2d.get_weight() in f32, flattened to (O, fan_in).

    Per-out-channel: fan_in**-0.5 * (w - mean) / (std + eps) * gain, with
    mean/std over all non-output dims (std unbiased=False, gamma=1.0), exactly
    as in the torch module.
    """
    out_ch = w.shape[0]
    wf = w.reshape(out_ch, -1).astype(jnp.float32)
    fan = wf.shape[1]
    mean = jnp.mean(wf, axis=1, keepdims=True)
    var = jnp.mean((wf - mean) ** 2, axis=1, keepdims=True)   # biased (ddof=0)
    std = jnp.sqrt(var)
    return (fan ** -0.5) * (wf - mean) / (std + EPS) * gain.reshape(out_ch, 1)


def bottleneck_kernel(x_ref, w1_ref, w2_ref, w3_ref, o_ref, pad_ref):
    # x_ref : (H, W, Cin)           bf16 activations (one image per grid step)
    # w1_ref: (Cin, width)          bf16 standardized 1x1 weight
    # w2_ref: (3, 3*width, width)   bf16 standardized 3x3 weight, one block per
    #                               ky, contraction columns ordered (kx, cin)
    # w3_ref: (width, Cout)         bf16 standardized 1x1 weight
    # o_ref : (H, W, Cout)          bf16 output
    # pad_ref: (H+2, W+2, width)    bf16 zero-padded conv1 activations
    H, W, Cin = x_ref.shape
    width = w1_ref.shape[1]
    Cout = w3_ref.shape[1]

    # Identity / pre-activation kept in f32 (elementwise on the VPU).
    xf = x_ref[...].astype(jnp.float32)
    x2d = xf.reshape(H * W, Cin)                                # f32 identity
    y = jnp.maximum(x2d, 0.0) * (GAMMA_RELU * BETA)

    # conv1 (1x1): bf16 operands, f32 accumulation on the MXU.
    a = jnp.dot(y.astype(jnp.bfloat16), w1_ref[...],
                preferred_element_type=jnp.float32)             # (H*W, width)
    a = jnp.maximum(a, 0.0) * GAMMA_RELU

    # Stage conv1 activations in the padded scratch. Zero only the 1-px
    # border; the interior is fully overwritten every grid step (border
    # zeroing, not "zero once at step 0", keeps this correct when the grid is
    # split across cores, where each core has its own scratch).
    zrow = jnp.zeros((1, W + 2, width), jnp.bfloat16)
    zcol = jnp.zeros((H + 2, 1, width), jnp.bfloat16)
    pad_ref[0:1, :, :] = zrow
    pad_ref[H + 1:H + 2, :, :] = zrow
    pad_ref[:, 0:1, :] = zcol
    pad_ref[:, W + 1:W + 2, :] = zcol
    pad_ref[1:H + 1, 1:W + 1, :] = a.reshape(H, W, width).astype(jnp.bfloat16)

    # conv2 (3x3, stride=1, pad=1). The kx concat is ky-independent, so build
    # it ONCE per grid step: imcols[y, x, kx*width:(kx+1)*width] =
    # padded[y, x+kx, :].  Then each ky matmul LHS is a row-band slice.
    imcols = jnp.concatenate(
        [pad_ref[:, 0:W, :], pad_ref[:, 1:W + 1, :], pad_ref[:, 2:W + 2, :]],
        axis=-1)                                                # (H+2, W, 3*width)

    acc = None                                                  # traced f32 acc
    for ky in range(3):
        lhs = imcols[ky:ky + H].reshape(H * W, 3 * width)       # bf16
        t = jnp.dot(lhs, w2_ref[ky], preferred_element_type=jnp.float32)
        acc = t if acc is None else acc + t                     # (H*W, width)

    b = jnp.maximum(acc, 0.0) * GAMMA_RELU                      # f32

    # conv3 (1x1) + residual: out = alpha * conv3(b) + identity (f32 add).
    c = jnp.dot(b.astype(jnp.bfloat16), w3_ref[...],
                preferred_element_type=jnp.float32)             # (H*W, Cout)
    out = c * ALPHA + x2d
    o_ref[...] = out.reshape(H, W, Cout).astype(o_ref.dtype)


def _default_vmem_limit():
    """Per-generation VMEM budget (v5e/v6e: 128 MiB, v7x: 64 MiB physical)."""
    try:
        cap = getattr(pltpu.get_tpu_info(), "vmem_capacity_bytes",
                      64 * 1024 * 1024)
    except Exception:
        cap = 64 * 1024 * 1024
    return min(int(cap * 0.85), 112 * 1024 * 1024)


def bottleneck_forward(x_nhwc, params, *, vmem_limit_bytes=None):
    """NF-ResNet Bottleneck forward.

    x_nhwc: (N, H, W, Cin) activations (any float dtype; cast to bf16).
    params: torch-layout (OIHW) weights + per-out-channel gains.
    Returns (N, H, W, Cout) bf16.  Keep the surrounding model NHWC so no
    layout transposes are needed around this call.
    """
    w1, g1, w2, g2, w3, g3 = params
    N, H, W, Cin = x_nhwc.shape
    width = w1.shape[0]
    Cout = w3.shape[0]
    assert Cin == Cout, "identity add requires inplanes == planes*expansion"

    # Weight standardization hoisted out of the kernel (f32), then cast to
    # bf16 MXU operands.
    w1s = _standardize_weight(w1, g1)                           # (width, Cin)
    w3s = _standardize_weight(w3, g3)                           # (Cout, width)
    # 3x3: permute OIHW -> O,KH,KW,I so flattened columns are tap-major
    # (ky, kx, cin); standardization is invariant to this column permutation.
    w2p = jnp.transpose(w2, (0, 2, 3, 1))                       # (O, 3, 3, I)
    w2s = _standardize_weight(w2p, g2)                          # (O, 9*I)

    w1b = jnp.transpose(w1s, (1, 0)).astype(jnp.bfloat16)       # (Cin, width)
    w3b = jnp.transpose(w3s, (1, 0)).astype(jnp.bfloat16)       # (width, Cout)
    w2b = jnp.transpose(w2s.reshape(width, 3, 3 * width),
                        (1, 2, 0)).astype(jnp.bfloat16)         # (3, 3*I, O)

    x = x_nhwc.astype(jnp.bfloat16)

    if vmem_limit_bytes is None:
        vmem_limit_bytes = _default_vmem_limit()

    out = pl.pallas_call(
        bottleneck_kernel,
        out_shape=jax.ShapeDtypeStruct((N, H, W, Cout), jnp.bfloat16),
        grid_spec=pltpu.PrefetchScalarGridSpec(
            num_scalar_prefetch=0,
            grid=(N,),
            in_specs=[
                # batch dim squeezed out of the kernel view
                pl.BlockSpec((None, H, W, Cin), lambda n: (n, 0, 0, 0)),
                pl.BlockSpec((Cin, width), lambda n: (0, 0)),
                pl.BlockSpec((3, 3 * width, width), lambda n: (0, 0, 0)),
                pl.BlockSpec((width, Cout), lambda n: (0, 0)),
            ],
            out_specs=pl.BlockSpec((None, H, W, Cout), lambda n: (n, 0, 0, 0)),
            scratch_shapes=[
                pltpu.VMEM((H + 2, W + 2, width), jnp.bfloat16),
            ],
        ),
        compiler_params=pltpu.CompilerParams(
            dimension_semantics=("parallel",),        # shard batch over TCs
            vmem_limit_bytes=vmem_limit_bytes,
        ),
    )(x, w1b, w2b, w3b)
    return out


def _reference_f32(x_nchw, params):
    """Pure-JAX f32 reference of the exact module forward (NCHW)."""
    w1, g1, w2, g2, w3, g3 = params

    def std_w(w, g):
        fan = w[0].size
        mean = jnp.mean(w, axis=(1, 2, 3), keepdims=True)
        std = jnp.std(w, axis=(1, 2, 3), keepdims=True)          # biased
        return (fan ** -0.5) * (w - mean) / (std + EPS) * g.reshape(-1, 1, 1, 1)

    def conv(x, w, pad):
        return lax.conv_general_dilated(
            x, w, (1, 1), [(pad, pad), (pad, pad)],
            dimension_numbers=('NCHW', 'OIHW', 'NCHW'))

    identity = x_nchw
    out = jnp.maximum(x_nchw, 0.0) * GAMMA_RELU * BETA
    out = conv(out, std_w(w1, g1), 0)
    out = jnp.maximum(out, 0.0) * GAMMA_RELU
    out = conv(out, std_w(w2, g2), 1)
    out = jnp.maximum(out, 0.0) * GAMMA_RELU
    out = conv(out, std_w(w3, g3), 0)
    return out * ALPHA + identity


def _reference_bf16_operands(x_nchw, params):
    """Same forward with bf16 conv operands + f32 accumulation, mirroring the
    kernel's MXU precision."""
    w1, g1, w2, g2, w3, g3 = params

    def std_w(w, g):
        fan = w[0].size
        mean = jnp.mean(w, axis=(1, 2, 3), keepdims=True)
        std = jnp.std(w, axis=(1, 2, 3), keepdims=True)
        s = (fan ** -0.5) * (w - mean) / (std + EPS) * g.reshape(-1, 1, 1, 1)
        return s.astype(jnp.bfloat16)

    def conv(x, w, pad):
        return lax.conv_general_dilated(
            x.astype(jnp.bfloat16), w, (1, 1), [(pad, pad), (pad, pad)],
            dimension_numbers=('NCHW', 'OIHW', 'NCHW'),
            preferred_element_type=jnp.float32)

    identity = x_nchw
    out = jnp.maximum(x_nchw, 0.0) * GAMMA_RELU * BETA
    out = conv(out, std_w(w1, g1), 0)
    out = jnp.maximum(out, 0.0) * GAMMA_RELU
    out = conv(out, std_w(w2, g2), 1)
    out = jnp.maximum(out, 0.0) * GAMMA_RELU
    out = conv(out, std_w(w3, g3), 0)
    return out * ALPHA + identity


if __name__ == "__main__":
    key = jax.random.PRNGKey(0)
    kx, k1, k2, k3 = jax.random.split(key, 4)

    # Small shapes consistent with the module: planes=4 -> width=4,
    # out = planes*expansion = 16, inplanes=16 so the residual add is valid.
    N, H, W = 2, 16, 16
    planes = 4
    inplanes = planes * 4      # 16
    width = planes             # base_width=64, groups=1
    cout = planes * 4          # 16

    x_nchw = jax.random.normal(kx, (N, inplanes, H, W), jnp.float32)
    w1 = jax.random.normal(k1, (width, inplanes, 1, 1), jnp.float32) * 0.1
    w2 = jax.random.normal(k2, (width, width, 3, 3), jnp.float32) * 0.1
    w3 = jax.random.normal(k3, (cout, width, 1, 1), jnp.float32) * 0.1
    # ScaledStdConv2d gain parameters are initialized to ones (as in __init__).
    g1 = jnp.ones((width,), jnp.float32)
    g2 = jnp.ones((width,), jnp.float32)
    g3 = jnp.ones((cout,), jnp.float32)
    params = (w1, g1, w2, g2, w3, g3)

    # Kernel I/O is NHWC bf16; in a real NHWC/bf16 model these conversions do
    # not exist on the hot path (they are test-harness only here).
    x_nhwc = jnp.transpose(x_nchw, (0, 2, 3, 1)).astype(jnp.bfloat16)

    out_nhwc = jax.block_until_ready(bottleneck_forward(x_nhwc, params))
    assert out_nhwc.shape == (N, H, W, cout)
    assert out_nhwc.dtype == jnp.bfloat16

    out_nchw = jnp.transpose(out_nhwc.astype(jnp.float32), (0, 3, 1, 2))
    # Feed the references the same bf16-quantized input the kernel saw.
    x_q_nchw = jnp.transpose(x_nhwc, (0, 3, 1, 2)).astype(jnp.float32)

    # Tight check against a reference using the same MXU precision
    # (bf16 operands, f32 accumulation, bf16 output).
    ref_bf16 = _reference_bf16_operands(x_q_nchw, params)
    ref_bf16 = ref_bf16.astype(jnp.bfloat16).astype(jnp.float32)
    err_b = float(jnp.max(jnp.abs(out_nchw - ref_bf16)))
    assert jnp.allclose(out_nchw, ref_bf16, rtol=2e-2, atol=2e-2), (
        f"bf16-matched ref: max abs err = {err_b}")

    # Loose check against full-f32 module semantics (bf16 operands / bf16
    # output add ~1e-2-level differences).
    ref_f32 = _reference_f32(x_q_nchw, params)
    err_f = float(jnp.max(jnp.abs(out_nchw - ref_f32)))
    assert jnp.allclose(out_nchw, ref_f32, rtol=6e-2, atol=6e-2), (
        f"f32 ref: max abs err = {err_f}")

    print("KERNEL_OK")
</pallas_src>

<mosaic_0001>
module attributes {stable_mosaic.version = 11 : i64} {
  func.func @bottleneck_kernel(%arg0: i32, %arg1: memref<1x16x16x16xbf16, #tpu.memory_space<vmem>>, %arg2: memref<16x4xbf16, #tpu.memory_space<vmem>>, %arg3: memref<3x12x4xbf16, #tpu.memory_space<vmem>>, %arg4: memref<4x16xbf16, #tpu.memory_space<vmem>>, %arg5: memref<1x16x16x16xbf16, #tpu.memory_space<vmem>>, %arg6: memref<18x18x4xbf16, #tpu.memory_space<vmem>>) attributes {dimension_semantics = [#tpu.dimension_semantics<parallel>], iteration_bounds = array<i64: 2>, scalar_prefetch = 0 : i64, scratch_operands = 1 : i64, tpu.core_type = #tpu.core_type<tc>, window_params = [{transform_indices = @transform_0, window_bounds = array<i64: 1, 16, 16, 16>}, {pipeline_mode = #tpu.pipeline_mode<synchronous>, transform_indices = @transform_1, window_bounds = array<i64: 16, 4>}, {pipeline_mode = #tpu.pipeline_mode<synchronous>, transform_indices = @transform_2, window_bounds = array<i64: 3, 12, 4>}, {pipeline_mode = #tpu.pipeline_mode<synchronous>, transform_indices = @transform_3, window_bounds = array<i64: 4, 16>}, {transform_indices = @transform_4, window_bounds = array<i64: 1, 16, 16, 16>}]} {
    %c0 = arith.constant 0 : index
    %c0_0 = arith.constant 0 : index
    %c0_1 = arith.constant 0 : index
    %c0_2 = arith.constant 0 : index
    %0 = vector.load %arg1[%c0, %c0_0, %c0_1, %c0_2] : memref<1x16x16x16xbf16, #tpu.memory_space<vmem>>, vector<1x16x16x16xbf16>
    %1 = vector.shape_cast %0 : vector<1x16x16x16xbf16> to vector<16x16x16xbf16>
    %2 = arith.extf %1 : vector<16x16x16xbf16> to vector<16x16x16xf32>
    %3 = vector.shape_cast %2 : vector<16x16x16xf32> to vector<256x16xf32>
    %cst = arith.constant 0.000000e+00 : f32
    %4 = vector.broadcast %cst : f32 to vector<256x16xf32>
    %5 = arith.maximumf %3, %4 : vector<256x16xf32>
    %cst_3 = arith.constant 1.71395886 : f32
    %6 = vector.broadcast %cst_3 : f32 to vector<256x16xf32>
    %7 = arith.mulf %5, %6 : vector<256x16xf32>
    %8 = arith.truncf %7 : vector<256x16xf32> to vector<256x16xbf16>
    %c0_4 = arith.constant 0 : index
    %c0_5 = arith.constant 0 : index
    %9 = vector.load %arg2[%c0_4, %c0_5] : memref<16x4xbf16, #tpu.memory_space<vmem>>, vector<16x4xbf16>
    %cst_6 = arith.constant dense<0.000000e+00> : vector<256x4xf32>
    %10 = tpu.matmul %8, %9, %cst_6 {dimension_numbers = #tpu.dot_dimension_numbers<[1], [0], [0], [1], [0, 0, 1, 1], [], []>} : vector<256x16xbf16>, vector<16x4xbf16>, vector<256x4xf32> -> vector<256x4xf32>
    %cst_7 = arith.constant 0.000000e+00 : f32
    %11 = vector.broadcast %cst_7 : f32 to vector<256x4xf32>
    %12 = arith.maximumf %10, %11 : vector<256x4xf32>
    %cst_8 = arith.constant 1.71395886 : f32
    %13 = vector.broadcast %cst_8 : f32 to vector<256x4xf32>
    %14 = arith.mulf %12, %13 : vector<256x4xf32>
    %cst_9 = arith.constant 0.000000e+00 : bf16
    %15 = vector.broadcast %cst_9 : bf16 to vector<1x18x4xbf16>
    %cst_10 = arith.constant 0.000000e+00 : bf16
    %16 = vector.broadcast %cst_10 : bf16 to vector<18x1x4xbf16>
    %c0_11 = arith.constant 0 : index
    %c0_12 = arith.constant 0 : index
    %c0_13 = arith.constant 0 : index
    %17 = vector.load %arg6[%c0_11, %c0_12, %c0_13] : memref<18x18x4xbf16, #tpu.memory_space<vmem>>, vector<1x18x4xbf16>
    tpu.vector_store %arg6[%c0_11, %c0_12, %c0_13], %15 {strides = array<i32>} : memref<18x18x4xbf16, #tpu.memory_space<vmem>>, vector<1x18x4xbf16>,
    %c17 = arith.constant 17 : index
    %c0_14 = arith.constant 0 : index
    %c0_15 = arith.constant 0 : index
    %18 = vector.load %arg6[%c17, %c0_14, %c0_15] : memref<18x18x4xbf16, #tpu.memory_space<vmem>>, vector<1x18x4xbf16>
    tpu.vector_store %arg6[%c17, %c0_14, %c0_15], %15 {strides = array<i32>} : memref<18x18x4xbf16, #tpu.memory_space<vmem>>, vector<1x18x4xbf16>,
    %c0_16 = arith.constant 0 : index
    %c0_17 = arith.constant 0 : index
    %c0_18 = arith.constant 0 : index
    %19 = vector.load %arg6[%c0_16, %c0_17, %c0_18] : memref<18x18x4xbf16, #tpu.memory_space<vmem>>, vector<18x1x4xbf16>
    tpu.vector_store %arg6[%c0_16, %c0_17, %c0_18], %16 {strides = array<i32>} : memref<18x18x4xbf16, #tpu.memory_space<vmem>>, vector<18x1x4xbf16>,
    %c0_19 = arith.constant 0 : index
    %c17_20 = arith.constant 17 : index
    %c0_21 = arith.constant 0 : index
    %20 = vector.load %arg6[%c0_19, %c17_20, %c0_21] : memref<18x18x4xbf16, #tpu.memory_space<vmem>>, vector<18x1x4xbf16>
    tpu.vector_store %arg6[%c0_19, %c17_20, %c0_21], %16 {strides = array<i32>} : memref<18x18x4xbf16, #tpu.memory_space<vmem>>, vector<18x1x4xbf16>,
    %21 = vector.shape_cast %14 : vector<256x4xf32> to vector<16x16x4xf32>
    %22 = arith.truncf %21 : vector<16x16x4xf32> to vector<16x16x4xbf16>
    %c1 = arith.constant 1 : index
    %c1_22 = arith.constant 1 : index
    %c0_23 = arith.constant 0 : index
    %23 = vector.load %arg6[%c1, %c1_22, %c0_23] : memref<18x18x4xbf16, #tpu.memory_space<vmem>>, vector<16x16x4xbf16>
    tpu.vector_store %arg6[%c1, %c1_22, %c0_23], %22 {strides = array<i32>} : memref<18x18x4xbf16, #tpu.memory_space<vmem>>, vector<16x16x4xbf16>,
    %c0_24 = arith.constant 0 : index
    %c0_25 = arith.constant 0 : index
    %c0_26 = arith.constant 0 : index
    %24 = vector.load %arg6[%c0_24, %c0_25, %c0_26] : memref<18x18x4xbf16, #tpu.memory_space<vmem>>, vector<18x16x4xbf16>
    %c0_27 = arith.constant 0 : index
    %c1_28 = arith.constant 1 : index
    %c0_29 = arith.constant 0 : index
    %25 = vector.load %arg6[%c0_27, %c1_28, %c0_29] : memref<18x18x4xbf16, #tpu.memory_space<vmem>>, vector<18x16x4xbf16>
    %c0_30 = arith.constant 0 : index
    %c2 = arith.constant 2 : index
    %c0_31 = arith.constant 0 : index
    %26 = vector.load %arg6[%c0_30, %c2, %c0_31] : memref<18x18x4xbf16, #tpu.memory_space<vmem>>, vector<18x16x4xbf16>
    %27 = tpu.concatenate %24, %25, %26 in 2 : vector<18x16x4xbf16>, vector<18x16x4xbf16>, vector<18x16x4xbf16> -> vector<18x16x12xbf16>
    %28 = vector.extract_strided_slice %27 {offsets = [0, 0, 0], sizes = [16, 16, 12], strides = [1, 1, 1]} : vector<18x16x12xbf16> to vector<16x16x12xbf16>
    %29 = vector.shape_cast %28 : vector<16x16x12xbf16> to vector<256x12xbf16>
    %c0_32 = arith.constant 0 : index
    %c0_33 = arith.constant 0 : index
    %c0_34 = arith.constant 0 : index
    %30 = vector.load %arg3[%c0_32, %c0_33, %c0_34] : memref<3x12x4xbf16, #tpu.memory_space<vmem>>, vector<1x12x4xbf16>
    %31 = vector.shape_cast %30 : vector<1x12x4xbf16> to vector<12x4xbf16>
    %cst_35 = arith.constant dense<0.000000e+00> : vector<256x4xf32>
    %32 = tpu.matmul %29, %31, %cst_35 {dimension_numbers = #tpu.dot_dimension_numbers<[1], [0], [0], [1], [0, 0, 1, 1], [], []>} : vector<256x12xbf16>, vector<12x4xbf16>, vector<256x4xf32> -> vector<256x4xf32>
    %33 = vector.extract_strided_slice %27 {offsets = [1, 0, 0], sizes = [16, 16, 12], strides = [1, 1, 1]} : vector<18x16x12xbf16> to vector<16x16x12xbf16>
    %34 = vector.shape_cast %33 : vector<16x16x12xbf16> to vector<256x12xbf16>
    %c1_36 = arith.constant 1 : index
    %c0_37 = arith.constant 0 : index
    %c0_38 = arith.constant 0 : index
    %35 = vector.load %arg3[%c1_36, %c0_37, %c0_38] : memref<3x12x4xbf16, #tpu.memory_space<vmem>>, vector<1x12x4xbf16>
    %36 = vector.shape_cast %35 : vector<1x12x4xbf16> to vector<12x4xbf16>
    %cst_39 = arith.constant dense<0.000000e+00> : vector<256x4xf32>
    %37 = tpu.matmul %34, %36, %cst_39 {dimension_numbers = #tpu.dot_dimension_numbers<[1], [0], [0], [1], [0, 0, 1, 1], [], []>} : vector<256x12xbf16>, vector<12x4xbf16>, vector<256x4xf32> -> vector<256x4xf32>
    %38 = arith.addf %32, %37 : vector<256x4xf32>
    %39 = vector.extract_strided_slice %27 {offsets = [2, 0, 0], sizes = [16, 16, 12], strides = [1, 1, 1]} : vector<18x16x12xbf16> to vector<16x16x12xbf16>
    %40 = vector.shape_cast %39 : vector<16x16x12xbf16> to vector<256x12xbf16>
    %c2_40 = arith.constant 2 : index
    %c0_41 = arith.constant 0 : index
    %c0_42 = arith.constant 0 : index
    %41 = vector.load %arg3[%c2_40, %c0_41, %c0_42] : memref<3x12x4xbf16, #tpu.memory_space<vmem>>, vector<1x12x4xbf16>
    %42 = vector.shape_cast %41 : vector<1x12x4xbf16> to vector<12x4xbf16>
    %cst_43 = arith.constant dense<0.000000e+00> : vector<256x4xf32>
    %43 = tpu.matmul %40, %42, %cst_43 {dimension_numbers = #tpu.dot_dimension_numbers<[1], [0], [0], [1], [0, 0, 1, 1], [], []>} : vector<256x12xbf16>, vector<12x4xbf16>, vector<256x4xf32> -> vector<256x4xf32>
    %44 = arith.addf %38, %43 : vector<256x4xf32>
    %cst_44 = arith.constant 0.000000e+00 : f32
    %45 = vector.broadcast %cst_44 : f32 to vector<256x4xf32>
    %46 = arith.maximumf %44, %45 : vector<256x4xf32>
    %cst_45 = arith.constant 1.71395886 : f32
    %47 = vector.broadcast %cst_45 : f32 to vector<256x4xf32>
    %48 = arith.mulf %46, %47 : vector<256x4xf32>
    %49 = arith.truncf %48 : vector<256x4xf32> to vector<256x4xbf16>
    %c0_46 = arith.constant 0 : index
    %c0_47 = arith.constant 0 : index
    %50 = vector.load %arg4[%c0_46, %c0_47] : memref<4x16xbf16, #tpu.memory_space<vmem>>, vector<4x16xbf16>
    %cst_48 = arith.constant dense<0.000000e+00> : vector<256x16xf32>
    %51 = tpu.matmul %49, %50, %cst_48 {dimension_numbers = #tpu.dot_dimension_numbers<[1], [0], [0], [1], [0, 0, 1, 1], [], []>} : vector<256x4xbf16>, vector<4x16xbf16>, vector<256x16xf32> -> vector<256x16xf32>
    %cst_49 = arith.constant 2.000000e-01 : f32
    %52 = vector.broadcast %cst_49 : f32 to vector<256x16xf32>
    %53 = arith.mulf %51, %52 : vector<256x16xf32>
    %54 = arith.addf %53, %3 : vector<256x16xf32>
    %55 = vector.shape_cast %54 : vector<256x16xf32> to vector<16x16x16xf32>
    %56 = arith.truncf %55 : vector<16x16x16xf32> to vector<16x16x16xbf16>
    %c0_50 = arith.constant 0 : index
    %c0_51 = arith.constant 0 : index
    %c0_52 = arith.constant 0 : index
    %c0_53 = arith.constant 0 : index
    %57 = vector.load %arg5[%c0_50, %c0_51, %c0_52, %c0_53] : memref<1x16x16x16xbf16, #tpu.memory_space<vmem>>, vector<1x16x16x16xbf16>
    %58 = vector.shape_cast %57 : vector<1x16x16x16xbf16> to vector<16x16x16xbf16>
    %59 = vector.shape_cast %56 : vector<16x16x16xbf16> to vector<1x16x16x16xbf16>
    tpu.vector_store %arg5[%c0_50, %c0_51, %c0_52, %c0_53], %59 {strides = array<i32>} : memref<1x16x16x16xbf16, #tpu.memory_space<vmem>>, vector<1x16x16x16xbf16>,
    return
  }
  func.func @transform_0(%arg0: i32) -> (i32, i32, i32, i32) {
    %c0_i32 = arith.constant 0 : i32
    %c0_i32_0 = arith.constant 0 : i32
    %c0_i32_1 = arith.constant 0 : i32
    %c0_i32_2 = arith.constant 0 : i32
    return %arg0, %c0_i32, %c0_i32_0, %c0_i32_1 : i32, i32, i32, i32
  }
  func.func @transform_1(%arg0: i32) -> (i32, i32) {
    %c0_i32 = arith.constant 0 : i32
    %c0_i32_0 = arith.constant 0 : i32
    %c0_i32_1 = arith.constant 0 : i32
    return %c0_i32, %c0_i32_0 : i32, i32
  }
  func.func @transform_2(%arg0: i32) -> (i32, i32, i32) {
    %c0_i32 = arith.constant 0 : i32
    %c0_i32_0 = arith.constant 0 : i32
    %c0_i32_1 = arith.constant 0 : i32
    %c0_i32_2 = arith.constant 0 : i32
    return %c0_i32, %c0_i32_0, %c0_i32_1 : i32, i32, i32
  }
  func.func @transform_3(%arg0: i32) -> (i32, i32) {
    %c0_i32 = arith.constant 0 : i32
    %c0_i32_0 = arith.constant 0 : i32
    %c0_i32_1 = arith.constant 0 : i32
    return %c0_i32, %c0_i32_0 : i32, i32
  }
  func.func @transform_4(%arg0: i32) -> (i32, i32, i32, i32) {
    %c0_i32 = arith.constant 0 : i32
    %c0_i32_0 = arith.constant 0 : i32
    %c0_i32_1 = arith.constant 0 : i32
    %c0_i32_2 = arith.constant 0 : i32
    return %arg0, %c0_i32, %c0_i32_0, %c0_i32_1 : i32, i32, i32, i32
  }
}

</mosaic_0001>

<bundles_post_ra>
// kernel: tpu_custom_call.1
= control target key start
LH: loop header
LB: loop body
LE: loop exit
PB: predicated region body
PF: predicated region fallthrough
CT: control target
= control target key end

     0   :  { %9 = vsyncpa [#allocation4], 0  ;;  %s4182_s0 = inlined_call_operand.hbm [shape: bf16[2,16,16,16], index: 0, kind: input, shape index: {}]   ;;  %s4183_s1 = inlined_call_operand.vmem [shape: bf16[16,4], index: 1, kind: input, shape index: {}]   ;;  %s4184_s2 = inlined_call_operand.vmem [shape: bf16[3,12,4], index: 2, kind: input, shape index: {}]   ;;  %s4185_s3 = inlined_call_operand.vmem [shape: bf16[4,16], index: 3, kind: input, shape index: {}]   ;;  %s4186_s4 = inlined_call_operand.hbm [shape: bf16[2,16,16,16], index: 4, kind: output, shape index: {}]  }
   0x1   :  { %11 = vsyncpa [#allocation4 + $0x1], 0 }
   0x2   :  { %12 = vsyncpa [#allocation5], 0 }
   0x3   :  { %14 = vsyncpa [#allocation5 + $0x1], 0  ;;  %s3144_s15 = smov 0   ;;  %s3146_s16 = smov 0  }
   0x4   :  { %s3148_s17 = smov 0   ;;  %s3150_s18 = smov 0  }
   0x5 LB: > { %s3165_s19 = sadd.s32 4294967295, %s3111_s18   ;;  %s2661_s20 = sadd.s32 4294967294, %s3111_s18   ;;  %s3111_s18 = sphi %s3150_s18, %s4268_s18   ;;  %s3107_s17 = sphi %s3148_s17, %s4267_s17   ;;  %s3103_s16 = sphi %s3146_s16, %s4266_s16   ;;  %s3099_s15 = sphi %s3144_s15, %s4265_s15  }
   0x6   : > { %s3169_s21 = sadd.s32 1, %s3111_s18   ;;  %s27_s22 = sadd.s32 1, %s3107_s17 }
   0x7   : > { %s24_s23 = ssub.s32 %s3111_s18, %s3169_s21  ;;  %p34_p0 = scmp.ne.s32.totalorder %s3107_s17, %s3103_s16 }
   0x8   : > { %p25_p1 = scmp.eq.s32.totalorder %s24_s23, 0  ;;  %p35_p2 = scmp.eq.s32.totalorder %s3111_s18, 0 }
   0x9   : > { %p40_p3 = scmp.ne.s32.totalorder %s3103_s16, %s3099_s15  ;;  %p41_p4 = scmp.eq.s32.totalorder %s3165_s19, 0 }
   0xa   : > { %s3181_s24 = scalar_select %p25_p1, %s3107_s17, %s27_s22  }
   0xb   : > { %p3183_p5 = por %p35_p2, %p34_p0  ;;  %p3187_p6 = por %p41_p4, %p40_p3 }
   0xc   : > { %p127_p7 = scmp.eq.s32.totalorder %s3165_s19, 1  ;;  %p133_p8 = scmp.eq.s32.totalorder %s2661_s20, 1 }
   0xd   : > { %p2946_p10 = scmp.lt.s32.totalorder %s3111_s18, 2  ;;  %s162_s29 = sand.u32 1, %s3107_s17  }
   0xe   : > { %p3194_p11 = por %p127_p7, %p34_p0  ;;  %p3198_p12 = por %p133_p8, %p40_p3 }
   0xf   : > { %s2775_s30 = sshll.u32 %s3111_s18, 7  ;;  %s2664_s5 = sshll.u32 %s162_s29, 7 }
  0x10   : > { %s171_s8 = scalar_lea.hbm %s4182_s0, %s2775_s30  ;;  %s166_s10 = scalar_lea.vmem [#allocation3], %s2664_s5 }
  0x11   : > { %s172_s9 = sshll.u32 %s171_s8, 4  ;;  %s174_s11 = sshll.u32 %s166_s10, 4  ;;  %s173_s9 = int_to_ptr.hbm [resolvable:$true] %s172_s9  ;;  %s175_s11 = int_to_ptr.vmem [resolvable:$true] %s174_s11 }
  0x12   : > { %p3209_p13 = pnand %p2946_p10, %p3183_p5  ;;  %p2667_p0 = scmp.ge.s32.totalorder %s3111_s18, 1 }
  0x13   : > { %p182_p1 = scmp.lt.s32.totalorder %s3111_s18, 3  ;;  %s163_s13 = scalar_lea.sflag [#allocation4], %s162_s29 }
  0x14   : > { %s3012_s14 = sshra.s32 %s173_s9, 4  ;;  %p3016_p3 = pneg %p3209_p13  ;;  %s3013_s14 = int_to_ptr.hbm [resolvable:$true] %s3012_s14 }
  0x15   : > { %s3014_s20 = scalar_lea.hbm %s3013_s14, 128  ;;  %s3019_s25 = scalar_lea.hbm %s4182_s0, 256 }
  0x16   : > { %p3015_p2 = scmp.ne.s32.totalorder %s3013_s14, %s3014_s20  ;;  %p3020_p5 = scmp.lt.s32.totalorder %s3013_s14, %s4182_s0 }
  0x17   : > { %p3021_p8 = scmp.lt.s32.totalorder %s3019_s25, %s3014_s20 }
  0x18   : > { %p3017_p4 = pnand %p3016_p3, %p3015_p2 }
  0x19   : > { %p3022_p10 = por %p3021_p8, %p3020_p5 }
  0x1a   : > { %p3018_p7 = pneg %p3017_p4 }
  0x1c   : > { %p3023_p9 = pnand %p3022_p10, %p3018_p7 }
  0x1e   : > { %3026 = shalt.err (!%p3023_p9)
}
  0x1f   : > { %s3113_s29 = smov 64   ;;  %s3114_s6 = smov 4  }
  0x20   : > { %2941 = dma.hbm_to_vmem [thread:$0]  (!%p3209_p13), %s173_s9, 2048, %s175_s11, %s163_s13, %s3113_s29, %s3113_s29, %s3114_s6  }
  0x21   : > { %p183_p2 = pnand %p2667_p0, %p182_p1 }
  0x22   : > { %s3230_s7 = sand.u32 (!%p183_p2), 1, %s3103_s16  }
  0x23   : > { %186 = sbr.rel (%p183_p2) target bundleno = 892 (0x37c), region = 36  ;;  %s2668_s8 = sshll.u32 (!%p183_p2), %s3230_s7, 7 }
  0x24   : > { %s189_s10 = scalar_lea.sflag (!%p183_p2), [#allocation4], %s3230_s7  ;;  %s3236_s14 = scalar_lea.vmem (!%p183_p2), [#allocation3], %s2668_s8 }
  0x28   : > { %3087 = dma.done.wait (%p3187_p6), %s189_s10, 2048  }
  0x29   : > { %3089 = vsyncadd (%p3187_p6), %s189_s10, 4294965248  ;;  %v2776_v0 = vld [vmem:[%s4183_s1] sm:$0xff]  ;;  %v3246_v1 = vld [vmem:[%s3236_s14] sm:$0xff]   ;;  %vm371_vm0 = vcmask 130048   ;;  %vm576_vm1 = vcmask 24576   ;;  %vm573_vm2 = vcmask 27648  }
  0x2a   : > { %v3249_v2 = vld [vmem:[%s3236_s14 + $0x20] sm:$0xff]   ;;  %v4218_v3 = vunpack.c.l.bf16 %v3246_v1  ;;  %v4217_v4 = vunpack.c.h.bf16 %v3246_v1  ;;  %427 = vmatpush.bf16.msra.mxu0 %v2776_v0  ;;  %2931 = vmatpush.bf16.msra.mxu1 %v2776_v0  ;;  %v3268_v17 = vld [vmem:[%s3236_s14 + $0x8] sm:$0xff]   ;;  %v3303_v45 = vld [vmem:[%s3236_s14 + $0x10] sm:$0xff]   ;;  %vm639_vm3 = vsmask.f32 7938  ;;  %s3116_s26 = smov 4  }
  0x2b   : > { %v4210_v5 = vunpack.c.l.bf16 %v3249_v2  ;;  %v4209_v6 = vunpack.c.h.bf16 %v3249_v2  ;;  %v3256_v7 = vld [vmem:[%s3236_s14 + $0x40] sm:$0xff]   ;;  %2932 = vmatpush.bf16.msra.mxu2 %v2776_v0  ;;  %2933 = vmatpush.bf16.msra.mxu3 %v2776_v0  ;;  %v3272_v20 = vld [vmem:[%s3236_s14 + $0x28] sm:$0xff]   ;;  %v4216_v24 = vunpack.c.l.bf16 %v3268_v17  ;;  %v4215_v25 = vunpack.c.h.bf16 %v3268_v17  ;;  %v3306_v47 = vld [vmem:[%s3236_s14 + $0x30] sm:$0xff]   ;;  %s3117_s12 = smov 8  }
  0x2c   : > { %v283_v8 = vmax.f32 %v4218_v3, 0.0  ;;  %v284_v9 = vmax.f32 %v4217_v4, 0.0  ;;  %v4202_v15 = vunpack.c.l.bf16 %v3256_v7  ;;  %v4201_v18 = vunpack.c.h.bf16 %v3256_v7  ;;  %v3285_v30 = vld [vmem:[%s3236_s14 + $0x48] sm:$0xff]   ;;  %v3315_v55 = vld [vmem:[%s3236_s14 + $0x60] sm:$0xff]   ;;  %v3318_v56 = vld [vmem:[%s3236_s14 + $0x50] sm:$0xff]  }
  0x2d   : > { %v291_v10 = vmax.f32 %v4210_v5, 0.0  ;;  %v292_v11 = vmax.f32 %v4209_v6, 0.0  ;;  %v4208_v27 = vunpack.c.l.bf16 %v3272_v20  ;;  %v4207_v28 = vunpack.c.h.bf16 %v3272_v20  ;;  %vm3413_vm4 = vmand %vm576_vm1, %vm639_vm3 }
  0x2e   : > { %v315_v12 = vmul.f32 1.7139589, %v283_v8  ;;  %v316_v13 = vmul.f32 1.7139589, %v284_v9  ;;  %v299_v21 = vmax.f32 %v4202_v15, 0.0  ;;  %v300_v23 = vmax.f32 %v4201_v18, 0.0  ;;  %vm3449_vm9 = vmand %vm573_vm2, %vm639_vm3 }
  0x2f   : > { %v323_v14 = vmul.f32 1.7139589, %v291_v10  ;;  %v324_v16 = vmul.f32 1.7139589, %v292_v11  ;;  %v285_v32 = vmax.f32 %v4216_v24, 0.0  ;;  %v286_v33 = vmax.f32 %v4215_v25, 0.0 }
  0x30   : > { %v347_v19 = vpack.c.bf16 %v316_v13, %v315_v12  ;;  %v331_v26 = vmul.f32 1.7139589, %v299_v21  ;;  %v332_v29 = vmul.f32 1.7139589, %v300_v23  ;;  %v293_v34 = vmax.f32 %v4208_v27, 0.0 }
  0x31   : > { %v351_v22 = vpack.c.bf16 %v324_v16, %v323_v14  ;;  %v294_v35 = vmax.f32 %v4207_v28, 0.0  ;;  %v4200_v36 = vunpack.c.l.bf16 %v3285_v30  ;;  %v4199_v37 = vunpack.c.h.bf16 %v3285_v30  ;;  %v3338_v16 = vld [vmem:[%s3236_s14 + $0x68] sm:$0xff]   ;;  %v653_v27 = vld [vmem:[#allocation2 + $0x38] sm:$0x1] }
  0x32   : > { %2674 = vmatmul.msk.bf16.vlgmr.msra.gmra.mxu0 %vm371_vm0, %v347_v19  ;;  %v355_v31 = vpack.c.bf16 %v332_v29, %v331_v26  ;;  %v317_v38 = vmul.f32 1.7139589, %v285_v32  ;;  %v318_v39 = vmul.f32 1.7139589, %v286_v33  ;;  %v325_v40 = vmul.f32 1.7139589, %v293_v34 }
  0x33   : > { %2678 = vmatmul.msk.bf16.vlgmr.msra.gmra.mxu1 %vm371_vm0, %v351_v22  ;;  %v326_v41 = vmul.f32 1.7139589, %v294_v35  ;;  %v301_v42 = vmax.f32 %v4200_v36, 0.0  ;;  %v302_v43 = vmax.f32 %v4199_v37, 0.0  ;;  %v4214_v50 = vunpack.c.l.bf16 %v3303_v45  ;;  %v3348_v33 = vld [vmem:[%s3236_s14 + $0x18] sm:$0xff]  }
  0x34   : > { %2682 = vmatmul.msk.bf16.vlgmr.msra.gmra.mxu2 %vm371_vm0, %v355_v31  ;;  %v348_v44 = vpack.c.bf16 %v318_v39, %v317_v38  ;;  %v4213_v51 = vunpack.c.h.bf16 %v3303_v45  ;;  %v4206_v52 = vunpack.c.l.bf16 %v3306_v47  ;;  %v4205_v53 = vunpack.c.h.bf16 %v3306_v47  ;;  %v3351_v38 = vld [vmem:[%s3236_s14 + $0x38] sm:$0xff]  }
  0x35   : > { %v352_v46 = vpack.c.bf16 %v326_v41, %v325_v40  ;;  %v333_v48 = vmul.f32 1.7139589, %v301_v42  ;;  %v334_v49 = vmul.f32 1.7139589, %v302_v43  ;;  %v287_v57 = vmax.f32 %v4214_v50, 0.0 }
  0x36   : > { %v4194_v58 = vunpack.c.l.bf16 %v3315_v55  ;;  %v4193_v59 = vunpack.c.h.bf16 %v3315_v55  ;;  %v288_v60 = vmax.f32 %v4213_v51, 0.0  ;;  %v295_v61 = vmax.f32 %v4206_v52, 0.0  ;;  %v668_v37 = vld [vmem:[#allocation2 + $0x74] sm:$0x1] }
  0x37   : > { %v356_v54 = vpack.c.bf16 %v334_v49, %v333_v48  ;;  %v296_v62 = vmax.f32 %v4205_v53, 0.0  ;;  %v4198_v63 = vunpack.c.l.bf16 %v3318_v56  ;;  %v4197_v0 = vunpack.c.h.bf16 %v3318_v56  ;;  %v3364_v48 = vld [vmem:[%s3236_s14 + $0x58] sm:$0xff]  }
  0x38   : > { %v307_v8 = vmax.f32 %v4194_v58, 0.0  ;;  %v308_v9 = vmax.f32 %v4193_v59, 0.0  ;;  %v319_v10 = vmul.f32 1.7139589, %v287_v57  ;;  %v320_v13 = vmul.f32 1.7139589, %v288_v60 }
  0x39   : > { %v327_v14 = vmul.f32 1.7139589, %v295_v61  ;;  %v328_v19 = vmul.f32 1.7139589, %v296_v62  ;;  %v303_v21 = vmax.f32 %v4198_v63, 0.0  ;;  %v304_v22 = vmax.f32 %v4197_v0, 0.0 }
  0x3a   : > { %v339_v11 = vmul.f32 1.7139589, %v307_v8  ;;  %v340_v12 = vmul.f32 1.7139589, %v308_v9  ;;  %v4192_v26 = vunpack.c.l.bf16 %v3338_v16  ;;  %v4191_v29 = vunpack.c.h.bf16 %v3338_v16 }
  0x3b   : > { %v349_v31 = vpack.c.bf16 %v320_v13, %v319_v10  ;;  %v353_v32 = vpack.c.bf16 %v328_v19, %v327_v14  ;;  %v335_v34 = vmul.f32 1.7139589, %v303_v21  ;;  %v336_v35 = vmul.f32 1.7139589, %v304_v22  ;;  %v3378_v13 = vld [vmem:[%s3236_s14 + $0x70] sm:$0xff]  }
  0x3c   : > { %v359_v23 = vpack.c.bf16 %v340_v12, %v339_v11  ;;  %v309_v39 = vmax.f32 %v4192_v26, 0.0  ;;  %v310_v40 = vmax.f32 %v4191_v29, 0.0  ;;  %v4212_v41 = vunpack.c.l.bf16 %v3348_v33 }
  0x3d   : > { %v4211_v42 = vunpack.c.h.bf16 %v3348_v33  ;;  %v4204_v43 = vunpack.c.l.bf16 %v3351_v38  ;;  %v4196_v8 = vunpack.c.l.bf16 %v3364_v48  ;;  %v4195_v9 = vunpack.c.h.bf16 %v3364_v48 }
  0x3e   : > { %2686 = vmatmul.msk.bf16.vlgmr.msra.gmra.mxu3 %vm371_vm0, %v359_v23  ;;  %v341_v49 = vmul.f32 1.7139589, %v309_v39  ;;  %v289_v57 = vmax.f32 %v4212_v41, 0.0  ;;  %v4190_v23 = vunpack.c.l.bf16 %v3378_v13  ;;  %vm583_vm5 = vsmask.f32 256 }
  0x3f   : > { %v290_v60 = vmax.f32 %v4211_v42, 0.0  ;;  %v297_v61 = vmax.f32 %v4204_v43, 0.0  ;;  %v305_v21 = vmax.f32 %v4196_v8, 0.0  ;;  %v306_v22 = vmax.f32 %v4195_v9, 0.0  ;;  %vm3421_vm6 = vmand %vm576_vm1, %vm583_vm5 }
  0x40   : > { %v321_v11 = vmul.f32 1.7139589, %v289_v57  ;;  %vm1380_vm7 = vsmask.f32 7424  ;;  %vm1687_vm8 = vcmask 1046528   ;;  %vm1895_vm12 = vcmask 1045504  }
  0x41   : > { %v322_v12 = vmul.f32 1.7139589, %v290_v60  ;;  %v329_v14 = vmul.f32 1.7139589, %v297_v61  ;;  %v338_v39 = vmul.f32 1.7139589, %v306_v22 }
  0x42   : > { %2675 = vmatmul.msk.bf16.gmra.mxu0 %vm371_vm0, %v348_v44  ;;  %v4203_v44 = vunpack.c.h.bf16 %v3351_v38  ;;  %v3395_v61 = vld [vmem:[%s3236_s14 + $0x78] sm:$0xff]   ;;  %vm727_vm10 = vsmask.f32 4368  ;;  %vm1778_vm13 = vcmask 31744   ;;  %vm1815_vm14 = vcmask 64512   ;;  %s3062_s14 = scalar_lea.hbm %s4186_s4, 256 }
  0x43   : > { %2679 = vmatmul.msk.bf16.gmra.mxu1 %vm371_vm0, %v352_v46  ;;  %v357_v46 = vpack.c.bf16 %v336_v35, %v335_v34  ;;  %v337_v35 = vmul.f32 1.7139589, %v305_v21  ;;  %v3115_v21 = vmov 0   ;;  %vm3463_vm11 = vmor %vm583_vm5, %vm727_vm10  ;;  %vm1862_vm15 = vcmask 97280  }
  0x44   : > { %2683 = vmatmul.msk.bf16.gmra.mxu2 %vm371_vm0, %v356_v54  ;;  %v342_v54 = vmul.f32 1.7139589, %v310_v40  ;;  %v298_v62 = vmax.f32 %v4203_v44, 0.0  ;;  %v311_v40 = vmax.f32 %v4190_v23, 0.0  ;;  %577 = vst.msk [vmem:[#allocation2 + $0x8] sm:$0x1] %vm576_vm1, %v3115_v21 }
  0x45   : > { %581 = vst.msk [vmem:[#allocation2 + $0xd4] sm:$0x1] %vm576_vm1, %v3115_v21  ;;  %vm2539_vm1 = vcmask 125952  }
  0x46   : > { %v360_v10 = vpack.c.bf16 %v342_v54, %v341_v49  ;;  %v330_v19 = vmul.f32 1.7139589, %v298_v62  ;;  %v358_v49 = vpack.c.bf16 %v338_v39, %v337_v35  ;;  %v343_v54 = vmul.f32 1.7139589, %v311_v40  ;;  %574 = vst.msk [vmem:[#allocation2] sm:$0xf] %vm573_vm2, %v3115_v21 }
  0x47   : > { %v4188_v62 = vunpack.c.l.bf16 %v3395_v61  ;;  %575 = vst.msk [vmem:[#allocation2 + $0x4] sm:$0xf] %vm573_vm2, %v3115_v21 }
  0x48   : > { %v354_v34 = vpack.c.bf16 %v330_v19, %v329_v14  ;;  %579 = vst.msk [vmem:[#allocation2 + $0xcc] sm:$0xf] %vm573_vm2, %v3115_v21 }
  0x49   : > { %580 = vst.msk [vmem:[#allocation2 + $0xd0] sm:$0xf] %vm573_vm2, %v3115_v21 }
  0x4d   : > { %v585_v40 = vld [vmem:[#allocation2] sm:$0x1] }
  0x4e   : > { %2687 = vmatmul.msk.bf16.gmra.mxu3 %vm371_vm0, %v360_v10  ;;  %v4187_v10 = vunpack.c.h.bf16 %v3395_v61 }
  0x52   : > { %2676 = vmatmul.msk.bf16.gmra.mxu0 %vm371_vm0, %v349_v31  ;;  %v4189_v31 = vunpack.c.h.bf16 %v3378_v13 }
  0x53   : > { %2680 = vmatmul.msk.bf16.gmra.mxu1 %vm371_vm0, %v353_v32  ;;  %v350_v32 = vpack.c.bf16 %v322_v12, %v321_v11  ;;  %v313_v11 = vmax.f32 %v4188_v62, 0.0  ;;  %v314_v12 = vmax.f32 %v4187_v10, 0.0 }
  0x54   : > { %2684 = vmatmul.msk.bf16.gmra.mxu2 %vm371_vm0, %v357_v46  ;;  %v312_v46 = vmax.f32 %v4189_v31, 0.0 }
  0x55   : > { %v345_v14 = vmul.f32 1.7139589, %v313_v11  ;;  %v346_v19 = vmul.f32 1.7139589, %v314_v12 }
  0x56   : > { %v344_v57 = vmul.f32 1.7139589, %v312_v46  ;;  %v586_v46 = vsel %vm3421_vm6, 0, %v585_v40 }
  0x57   : > { %v362_v22 = vpack.c.bf16 %v346_v19, %v345_v14  ;;  %587 = vst [vmem:[#allocation2] sm:$0x1] %v586_v46  ;;  %v2904_v46 = vld [vmem:[#allocation2] sm:$0xf0] }
  0x58   : > { %v361_v60 = vpack.c.bf16 %v344_v57, %v343_v54 }
  0x5e   : > { %2688 = vmatmul.msk.bf16.gmra.mxu3 %vm371_vm0, %v361_v60  ;;  %v2846_v57 = vld [vmem:[#allocation2] sm:$0xff]  }
  0x5f   : > { %v1384_v11 = vshll.u32 %v2846_v57, 16  ;;  %v1382_v12 = vshrl.u32 %v2846_v57, 16 }
  0x61   : > { %v1386_v14 = vrot.slane %v1384_v11, 1 }
  0x62   : > { %2677 = vmatmul.msk.bf16.gmra.mxu0 %vm371_vm0, %v350_v32 }
  0x63   : > { %2681 = vmatmul.msk.bf16.gmra.mxu1 %vm371_vm0, %v354_v34  ;;  %v641_v34 = vld [vmem:[#allocation2 + $0x8] sm:$0x1]  ;;  %v1387_v21 = vor.u32 %v1386_v14, %v1382_v12  ;;  %v644_v12 = vld [vmem:[#allocation2 + $0x14] sm:$0x1] }
  0x64   : > { %2685 = vmatmul.msk.bf16.gmra.mxu2 %vm371_vm0, %v358_v49  ;;  %v642_v35 = vsel %vm3413_vm4, 0, %v641_v34  ;;  %v645_v14 = vsel %vm3413_vm4, 0, %v644_v12 }
  0x65   : > { %643 = vst [vmem:[#allocation2 + $0x8] sm:$0x1] %v642_v35  ;;  %v588_v35 = vld [vmem:[#allocation2 + $0xc] sm:$0x1] }
  0x66   : > { %v589_v40 = vsel %vm3421_vm6, 0, %v588_v35  ;;  %646 = vst [vmem:[#allocation2 + $0x14] sm:$0x1] %v645_v14  ;;  %v656_v35 = vld [vmem:[#allocation2 + $0x44] sm:$0x1] }
  0x67   : > { %590 = vst [vmem:[#allocation2 + $0xc] sm:$0x1] %v589_v40  ;;  %v657_v40 = vsel %vm3413_vm4, 0, %v656_v35 }
  0x68   : > { %658 = vst [vmem:[#allocation2 + $0x44] sm:$0x1] %v657_v40 }
  0x6c   : > { %v1200_v49 = vld [vmem:[#allocation2 + $0x8] sm:$0x1] }
  0x6d   : > { %v1344_v54 = vunpack.c.l.b16 %v1200_v49  ;;  %v2905_v49 = vld [vmem:[#allocation2] sm:$0xe] }
  0x6e   : > { %2689 = vmatmul.msk.bf16.gmra.mxu3 %vm371_vm0, %v362_v22  ;;  %vm2350_vm0 = vcmask 1041408  }
  0x6f   : > { %v1362_v60 = vpack.c.b16 %v1344_v54, %v1344_v54  ;;  %v2906_v54 = vor.u32 %v2905_v49, %v2904_v46 }
  0x71   : > { %v1389_v19 = vshll.u32 %v1362_v60, 16  ;;  %v1688_v10 = vrot.slane %v2906_v54, 1  ;;  %v1689_v57 = vrot.slane %v1362_v60, 1 }
  0x73   : > { %v1391_v22 = vrot.slane %v1389_v19, 1  ;;  %v1690_v11 = vsel %vm1687_vm8, %v1688_v10, %v1689_v57  ;;  %v591_v19 = vld [vmem:[#allocation2 + $0x18] sm:$0x1] }
  0x75   : > { %v1392_v34 = vsel %vm1380_vm7, %v1387_v21, %v1391_v22  ;;  %v592_v21 = vsel %vm3421_vm6, 0, %v591_v19  ;;  %v600_v22 = vld [vmem:[#allocation2 + $0x3c] sm:$0x1] }
  0x76   : > { %1597 = vrot.lane.b32.xlu0 %v1392_v34, %s3116_s26  ;;  %593 = vst [vmem:[#allocation2 + $0x18] sm:$0x1] %v592_v21  ;;  %v601_v60 = vsel %vm3421_vm6, 0, %v600_v22  ;;  %v647_v34 = vld [vmem:[#allocation2 + $0x20] sm:$0x1] }
  0x77   : > { %602 = vst [vmem:[#allocation2 + $0x3c] sm:$0x1] %v601_v60  ;;  %v648_v10 = vsel %vm3413_vm4, 0, %v647_v34  ;;  %v603_v22 = vld [vmem:[#allocation2 + $0x48] sm:$0x1] }
  0x78   : > { %649 = vst [vmem:[#allocation2 + $0x20] sm:$0x1] %v648_v10  ;;  %v604_v34 = vsel %vm3421_vm6, 0, %v603_v22  ;;  %v594_v10 = vld [vmem:[#allocation2 + $0x24] sm:$0x1] }
  0x79   : > { %605 = vst [vmem:[#allocation2 + $0x48] sm:$0x1] %v604_v34 }
  0x7e   : > { %1742 = vrot.lane.b32.xlu0 %v1690_v11, %s3117_s12 }
  0xaf   : > { %v429_v46 = vpop.f32.mrf.mxu0 }
  0xb0   : > { %v509_v49 = vmax.f32 %v429_v46, 0.0  ;;  %v449_v54 = vpop.f32.mrf.mxu1  ;;  %v595_v46 = vsel %vm3421_vm6, 0, %v594_v10 }
  0xb1   : > { %v517_v57 = vmax.f32 %v449_v54, 0.0  ;;  %v1052_v54 = vld [vmem:[#allocation2 + $0xc] sm:$0xf]  ;;  %596 = vst [vmem:[#allocation2 + $0x24] sm:$0x1] %v595_v46 }
  0xb2   : > { %v541_v11 = vmul.f32 1.7139589, %v509_v49 }
  0xb3   : > { %v549_v12 = vmul.f32 1.7139589, %v517_v57 }
  0xb4   : > { %v695_v14 = vpack.c.bf16 %v541_v11, %v541_v11 }
  0xb5   : > { %v703_v19 = vpack.c.bf16 %v549_v12, %v549_v12 }
  0xb6   : > { %v730_v21 = vshrl.u32 %v695_v14, 16  ;;  %v733_v35 = vshll.u32 %v695_v14, 16 }
  0xb7   : > { %v431_v60 = vpop.f32.mrf.mxu0  ;;  %v798_v62 = vshrl.u32 %v703_v19, 16  ;;  %v801_v31 = vshll.u32 %v703_v19, 16  ;;  %v469_v26 = vpop.f32.mrf.mxu2 }
  0xb8   : > { %v732_v23 = vrot.slane %v730_v21, 7  ;;  %v510_v29 = vmax.f32 %v431_v60, 0.0  ;;  %v451_v40 = vpop.f32.mrf.mxu1  ;;  %v1080_v21 = vld [vmem:[#allocation2 + $0x3c] sm:$0xf]  ;;  %v650_v60 = vld [vmem:[#allocation2 + $0x2c] sm:$0x1] }
  0xb9   : > { %v800_v57 = vrot.slane %v798_v62, 7  ;;  %v518_v11 = vmax.f32 %v451_v40, 0.0  ;;  %v659_v62 = vld [vmem:[#allocation2 + $0x50] sm:$0x1]  ;;  %v525_v40 = vmax.f32 %v469_v26, 0.0 }
  0xba   : > { %v735_v12 = vor.u32 %v733_v35, %v732_v23  ;;  %v542_v19 = vmul.f32 1.7139589, %v510_v29  ;;  %v660_v29 = vsel %vm3413_vm4, 0, %v659_v62  ;;  %v736_v35 = vrot.slane %v732_v23, 4  ;;  %v612_v23 = vld [vmem:[#allocation2 + $0x6c] sm:$0x1] }
  0xbb   : > { %v803_v14 = vor.u32 %v801_v31, %v800_v57  ;;  %v550_v22 = vmul.f32 1.7139589, %v518_v11  ;;  %v651_v31 = vsel %vm3413_vm4, 0, %v650_v60  ;;  %v804_v11 = vrot.slane %v800_v57, 4  ;;  %661 = vst [vmem:[#allocation2 + $0x50] sm:$0x1] %v660_v29 }
  0xbc   : > { %v1053_v34 = vsel %vm3449_vm9, %v735_v12, %v1052_v54  ;;  %v696_v10 = vpack.c.bf16 %v542_v19, %v542_v19  ;;  %v1056_v54 = vld [vmem:[#allocation2 + $0x14] sm:$0x1]  ;;  %v557_v26 = vmul.f32 1.7139589, %v525_v40  ;;  %652 = vst [vmem:[#allocation2 + $0x2c] sm:$0x1] %v651_v31 }
  0xbd   : > { %1054 = vst [vmem:[#allocation2 + $0xc] sm:$0xf] %v1053_v34  ;;  %v1081_v59 = vsel %vm3449_vm9, %v803_v14, %v1080_v21  ;;  %v704_v58 = vpack.c.bf16 %v550_v22, %v550_v22 }
  0xbe   : > { %v738_v46 = vshrl.u32 %v696_v10, 16  ;;  %1082 = vst [vmem:[#allocation2 + $0x3c] sm:$0xf] %v1081_v59  ;;  %v741_v21 = vshll.u32 %v696_v10, 16  ;;  %v613_v10 = vsel %vm3421_vm6, 0, %v612_v23 }
  0xbf   : > { %v434_v12 = vpop.f32.mrf.mxu0  ;;  %v806_v19 = vshrl.u32 %v704_v58, 16  ;;  %v809_v34 = vshll.u32 %v704_v58, 16  ;;  %v1084_v58 = vld [vmem:[#allocation2 + $0x44] sm:$0x1]  ;;  %614 = vst [vmem:[#allocation2 + $0x6c] sm:$0x1] %v613_v10 }
  0xc0   : > { %v740_v9 = vrot.slane %v738_v46, 7  ;;  %v511_v14 = vmax.f32 %v434_v12, 0.0  ;;  %v454_v22 = vpop.f32.mrf.mxu1  ;;  %v711_v12 = vpack.c.bf16 %v557_v26, %v557_v26  ;;  %v1059_v26 = vld [vmem:[#allocation2 + $0x18] sm:$0xf] }
  0xc1   : > { %v808_v62 = vrot.slane %v806_v19, 7  ;;  %v519_v60 = vmax.f32 %v454_v22, 0.0 }
  0xc2   : > { %v743_v57 = vor.u32 %v741_v21, %v740_v9  ;;  %v745_v8 = vrot.slane %v740_v9, 4  ;;  %v543_v0 = vmul.f32 1.7139589, %v511_v14  ;;  %v866_v21 = vshrl.u32 %v711_v12, 16  ;;  %v1091_v43 = vld [vmem:[#allocation2 + $0x50] sm:$0x1] }
  0xc3   : > { %v811_v46 = vor.u32 %v809_v34, %v808_v62  ;;  %v813_v29 = vrot.slane %v808_v62, 4  ;;  %v551_v40 = vmul.f32 1.7139589, %v519_v60 }
  0xc4   : > { %v744_v63 = vsel %vm3463_vm11, %v736_v35, %v743_v57  ;;  %v1057_v19 = vsel %vm3421_vm6, %v745_v8, %v1056_v54  ;;  %v697_v22 = vpack.c.bf16 %v543_v0, %v543_v0  ;;  %v3479_v8 = vrot.slane %v866_v21, 7  ;;  %v1087_v57 = vld [vmem:[#allocation2 + $0x48] sm:$0xf] }
  0xc5   : > { %1055 = vst.msk [vmem:[#allocation2 + $0x10] sm:$0xf] %vm573_vm2, %v744_v63  ;;  %v812_v9 = vsel %vm3463_vm11, %v804_v11, %v811_v46  ;;  %v1085_v31 = vsel %vm3421_vm6, %v813_v29, %v1084_v58  ;;  %v705_v34 = vpack.c.bf16 %v551_v40, %v551_v40  ;;  %v869_v0 = vshll.u32 %v711_v12, 16  ;;  %v3481_v63 = vld [vmem:[#allocation2 + $0xc] sm:$0xe] }
  0xc6   : > { %1058 = vst [vmem:[#allocation2 + $0x14] sm:$0x1] %v1057_v19  ;;  %v747_v14 = vshrl.u32 %v697_v22, 16  ;;  %v750_v11 = vshll.u32 %v697_v22, 16  ;;  %v872_v40 = vrot.slane %v3479_v8, 4 }
  0xc7   : > { %1083 = vst.msk [vmem:[#allocation2 + $0x40] sm:$0xf] %vm573_vm2, %v812_v9  ;;  %v436_v35 = vpop.f32.mrf.mxu0  ;;  %v815_v62 = vshrl.u32 %v705_v34, 16  ;;  %v818_v60 = vshll.u32 %v705_v34, 16  ;;  %v871_v29 = vor.u32 %v869_v0, %v3479_v8  ;;  %v606_v19 = vld [vmem:[#allocation2 + $0x54] sm:$0x1]  ;;  %v471_v0 = vpop.f32.mrf.mxu2 }
  0xc8   : > { %v3483_v54 = vrot.slane %v747_v14, 7  ;;  %1086 = vst [vmem:[#allocation2 + $0x44] sm:$0x1] %v1085_v31  ;;  %v512_v23 = vmax.f32 %v436_v35, 0.0  ;;  %v456_v58 = vpop.f32.mrf.mxu1  ;;  %v1108_v21 = vld [vmem:[#allocation2 + $0x6c] sm:$0xf] }
  0xc9   : > { %v3485_v10 = vrot.slane %v815_v62, 7  ;;  %v520_v46 = vmax.f32 %v456_v58, 0.0  ;;  %v607_v22 = vsel %vm3421_vm6, 0, %v606_v19  ;;  %v1109_v62 = vsel %vm3449_vm9, %v871_v29, %v1108_v21 }
  0xca   : > { %v752_v9 = vor.u32 %v750_v11, %v3483_v54  ;;  %v753_v12 = vrot.slane %v3483_v54, 4  ;;  %v544_v34 = vmul.f32 1.7139589, %v512_v23  ;;  %608 = vst [vmem:[#allocation2 + $0x54] sm:$0x1] %v607_v22  ;;  %v526_v19 = vmax.f32 %v471_v0, 0.0 }
  0xcb   : > { %v820_v31 = vor.u32 %v818_v60, %v3485_v10  ;;  %v821_v14 = vrot.slane %v3485_v10, 4  ;;  %v552_v35 = vmul.f32 1.7139589, %v520_v46  ;;  %1110 = vst [vmem:[#allocation2 + $0x6c] sm:$0xf] %v1109_v62  ;;  %v669_v62 = vsel %vm3413_vm4, 0, %v668_v37 }
  0xcc   : > { %v1060_v11 = vsel %vm3449_vm9, %v752_v9, %v1059_v26  ;;  %v698_v58 = vpack.c.bf16 %v544_v34, %v544_v34  ;;  %v3499_v54 = vld [vmem:[#allocation2 + $0xc] sm:$0xff]   ;;  %v558_v36 = vmul.f32 1.7139589, %v526_v19  ;;  %670 = vst [vmem:[#allocation2 + $0x74] sm:$0x1] %v669_v62 }
  0xcd   : > { %v3501_v23 = vld [vmem:[#allocation2 + $0xc] sm:$0xf0]  ;;  %1061 = vst [vmem:[#allocation2 + $0x18] sm:$0xf] %v1060_v11  ;;  %v1088_v60 = vsel %vm3449_vm9, %v820_v31, %v1087_v57  ;;  %v706_v10 = vpack.c.bf16 %v552_v35, %v552_v35  ;;  %v1201_v46 = vld [vmem:[#allocation2 + $0x14] sm:$0x1] }
  0xce   : > { %v755_v29 = vshrl.u32 %v698_v58, 16  ;;  %v758_v21 = vshll.u32 %v698_v58, 16  ;;  %1089 = vst [vmem:[#allocation2 + $0x48] sm:$0xf] %v1088_v60  ;;  %v1345_v22 = vunpack.c.l.b16 %v1201_v46  ;;  %v712_v57 = vpack.c.bf16 %v558_v36, %v558_v36  ;;  %v1063_v31 = vld [vmem:[#allocation2 + $0x20] sm:$0x1] }
  0xcf   : > { %v439_v26 = vpop.f32.mrf.mxu0  ;;  %v823_v9 = vshrl.u32 %v706_v10, 16  ;;  %v826_v34 = vshll.u32 %v706_v10, 16  ;;  %v1394_v58 = vshrl.u32 %v3499_v54, 16  ;;  %v1396_v19 = vshll.u32 %v3499_v54, 16 }
  0xd0   : > { %v757_v18 = vrot.slane %v755_v29, 7  ;;  %v513_v0 = vmax.f32 %v439_v26, 0.0  ;;  %v459_v15 = vpop.f32.mrf.mxu1  ;;  %v3507_v11 = vpack.c.b16 %v1345_v22, %v1345_v22  ;;  %v877_v52 = vshll.u32 %v712_v57, 16 }
  0xd1   : > { %v825_v35 = vrot.slane %v823_v9, 7  ;;  %v521_v44 = vmax.f32 %v459_v15, 0.0  ;;  %v1398_v22 = vrot.slane %v1396_v19, 1 }
  0xd2   : > { %v760_v60 = vor.u32 %v758_v21, %v757_v18  ;;  %v762_v46 = vrot.slane %v757_v18, 4  ;;  %v545_v10 = vmul.f32 1.7139589, %v513_v0  ;;  %v1401_v37 = vshll.u32 %v3507_v11, 16 }
  0xd3   : > { %v828_v29 = vor.u32 %v826_v34, %v825_v35  ;;  %v830_v26 = vrot.slane %v825_v35, 4  ;;  %v553_v53 = vmul.f32 1.7139589, %v521_v44  ;;  %v1399_v0 = vor.u32 %v1398_v22, %v1394_v58  ;;  %v597_v44 = vld [vmem:[#allocation2 + $0x30] sm:$0x1] }
  0xd4   : > { %v761_v36 = vsel %vm3463_vm11, %v753_v12, %v760_v60  ;;  %v1064_v15 = vsel %vm3421_vm6, %v762_v46, %v1063_v31  ;;  %v699_v9 = vpack.c.bf16 %v545_v10, %v545_v10  ;;  %v1403_v62 = vrot.slane %v1401_v37, 1  ;;  %v662_v35 = vld [vmem:[#allocation2 + $0x5c] sm:$0x1]  ;;  %v1066_v31 = vld [vmem:[#allocation2 + $0x24] sm:$0xf] }
  0xd5   : > { %1062 = vst.msk [vmem:[#allocation2 + $0x1c] sm:$0xf] %vm573_vm2, %v761_v36  ;;  %v829_v18 = vsel %vm3463_vm11, %v821_v14, %v828_v29  ;;  %v1092_v21 = vsel %vm3421_vm6, %v830_v26, %v1091_v43  ;;  %v707_v34 = vpack.c.bf16 %v553_v53, %v553_v53  ;;  %v874_v60 = vshrl.u32 %v712_v57, 16  ;;  %v474_v53 = vpop.f32.mrf.mxu2  ;;  %v1094_v26 = vld [vmem:[#allocation2 + $0x54] sm:$0xf] }
  0xd6   : > { %1065 = vst [vmem:[#allocation2 + $0x20] sm:$0x1] %v1064_v15  ;;  %v764_v19 = vshrl.u32 %v699_v9, 16  ;;  %v767_v12 = vshll.u32 %v699_v9, 16  ;;  %v1404_v14 = vsel %vm1380_vm7, %v1399_v0, %v1403_v62  ;;  %v2990_v43 = vor.u32 %v3481_v63, %v3501_v23  ;;  %v1112_v22 = vld [vmem:[#allocation2 + $0x74] sm:$0x1] }
  0xd7   : > { %1090 = vst.msk [vmem:[#allocation2 + $0x4c] sm:$0xf] %vm573_vm2, %v829_v18  ;;  %v441_v46 = vpop.f32.mrf.mxu0  ;;  %v832_v10 = vshrl.u32 %v707_v34, 16  ;;  %v835_v37 = vshll.u32 %v707_v34, 16  ;;  %1599 = vrot.lane.b32.xlu2 %v1404_v14, %s3116_s26  ;;  %v876_v57 = vrot.slane %v874_v60, 7  ;;  %v598_v36 = vsel %vm3421_vm6, 0, %v597_v44 }
  0xd8   : > { %v3525_v58 = vrot.slane %v764_v19, 7  ;;  %1093 = vst [vmem:[#allocation2 + $0x50] sm:$0x1] %v1092_v21  ;;  %v514_v29 = vmax.f32 %v441_v46, 0.0  ;;  %v461_v15 = vpop.f32.mrf.mxu1  ;;  %v663_v63 = vsel %vm3413_vm4, 0, %v662_v35  ;;  %v1691_v23 = vrot.slane %v2990_v43, 1 }
  0xd9   : > { %v3530_v9 = vrot.slane %v832_v10, 7  ;;  %599 = vst [vmem:[#allocation2 + $0x30] sm:$0x1] %v598_v36  ;;  %v522_v62 = vmax.f32 %v461_v15, 0.0  ;;  %v879_v0 = vor.u32 %v877_v52, %v876_v57  ;;  %v881_v60 = vrot.slane %v876_v57, 4 }
  0xda   : > { %v769_v18 = vor.u32 %v767_v12, %v3525_v58  ;;  %v770_v21 = vrot.slane %v3525_v58, 4  ;;  %v546_v34 = vmul.f32 1.7139589, %v514_v29  ;;  %664 = vst [vmem:[#allocation2 + $0x5c] sm:$0x1] %v663_v63  ;;  %v1692_v12 = vrot.slane %v3507_v11, 1 }
  0xdb   : > { %v837_v19 = vor.u32 %v835_v37, %v3530_v9  ;;  %v838_v44 = vrot.slane %v3530_v9, 4  ;;  %v554_v46 = vmul.f32 1.7139589, %v522_v62  ;;  %v615_v10 = vld [vmem:[#allocation2 + $0x78] sm:$0x1]  ;;  %v880_v35 = vsel %vm3463_vm11, %v872_v40, %v879_v0  ;;  %v3556_v62 = vld [vmem:[#allocation2 + $0x3c] sm:$0xff]  }
  0xdc   : > { %v1067_v14 = vsel %vm3449_vm9, %v769_v18, %v1066_v31  ;;  %v700_v36 = vpack.c.bf16 %v546_v34, %v546_v34  ;;  %v3545_v52 = vld [vmem:[#allocation2 + $0x18] sm:$0xf0]  ;;  %v1113_v43 = vsel %vm3421_vm6, %v881_v60, %v1112_v22  ;;  %v527_v29 = vmax.f32 %v474_v53, 0.0  ;;  %v3551_v15 = vld [vmem:[#allocation2 + $0x18] sm:$0xe] }
  0xdd   : > { %1068 = vst [vmem:[#allocation2 + $0x24] sm:$0xf] %v1067_v14  ;;  %v1095_v37 = vsel %vm3449_vm9, %v837_v19, %v1094_v26  ;;  %v708_v58 = vpack.c.bf16 %v554_v46, %v554_v46  ;;  %v2896_v31 = vld [vmem:[#allocation2 + $0x18] sm:$0xff]   ;;  %v1202_v57 = vld [vmem:[#allocation2 + $0x20] sm:$0x1]  ;;  %v1693_v40 = vsel %vm1687_vm8, %v1691_v23, %v1692_v12  ;;  %v616_v11 = vsel %vm3421_vm6, 0, %v615_v10  ;;  %v476_v12 = vpop.f32.mrf.mxu2 }
  0xde   : > { %v772_v8 = vshrl.u32 %v700_v36, 16  ;;  %v775_v9 = vshll.u32 %v700_v36, 16  ;;  %1096 = vst [vmem:[#allocation2 + $0x54] sm:$0xf] %v1095_v37  ;;  %v3558_v26 = vld [vmem:[#allocation2 + $0x3c] sm:$0xf0]  ;;  %v1346_v34 = vunpack.c.l.b16 %v1202_v57  ;;  %v2909_v60 = vor.u32 %v3551_v15, %v3545_v52  ;;  %v489_v15 = vpop.f32.mrf.mxu3 }
  0xdf   : > { %1111 = vst.msk [vmem:[#allocation2 + $0x70] sm:$0xf] %vm573_vm2, %v880_v35  ;;  %v444_v22 = vpop.f32.mrf.mxu0  ;;  %v840_v53 = vshrl.u32 %v708_v58, 16  ;;  %v843_v63 = vshll.u32 %v708_v58, 16  ;;  %v559_v18 = vmul.f32 1.7139589, %v527_v29  ;;  %1744 = vrot.lane.b32.xlu2 %v1693_v40, %s3117_s12 }
  0xe0   : > { %v774_v0 = vrot.slane %v772_v8, 7  ;;  %1114 = vst [vmem:[#allocation2 + $0x74] sm:$0x1] %v1113_v43  ;;  %v515_v19 = vmax.f32 %v444_v22, 0.0  ;;  %v464_v23 = vpop.f32.mrf.mxu1  ;;  %v1070_v46 = vld [vmem:[#allocation2 + $0x2c] sm:$0x1]  ;;  %v3564_v36 = vpack.c.b16 %v1346_v34, %v1346_v34 }
  0xe1   : > { %v842_v10 = vrot.slane %v840_v53, 7  ;;  %617 = vst [vmem:[#allocation2 + $0x78] sm:$0x1] %v616_v11  ;;  %v713_v14 = vpack.c.bf16 %v559_v18, %v559_v18  ;;  %v1406_v35 = vshrl.u32 %v2896_v31, 16  ;;  %v1098_v57 = vld [vmem:[#allocation2 + $0x5c] sm:$0x1] }
  0xe2   : > { %v777_v37 = vor.u32 %v775_v9, %v774_v0  ;;  %v779_v58 = vrot.slane %v774_v0, 4  ;;  %v547_v29 = vmul.f32 1.7139589, %v515_v19  ;;  %v1408_v43 = vshll.u32 %v2896_v31, 16  ;;  %v609_v34 = vld [vmem:[#allocation2 + $0x60] sm:$0x1] }
  0xe3   : > { %v845_v8 = vor.u32 %v843_v63, %v842_v10  ;;  %v847_v22 = vrot.slane %v842_v10, 4  ;;  %v883_v40 = vshrl.u32 %v713_v14, 16  ;;  %v886_v28 = vshll.u32 %v713_v14, 16  ;;  %v2913_v41 = vld [vmem:[#allocation2 + $0x48] sm:$0xf0] }
  0xe4   : > { %v778_v6 = vsel %vm3463_vm11, %v770_v21, %v777_v37  ;;  %v1071_v11 = vsel %vm3421_vm6, %v779_v58, %v1070_v46  ;;  %v701_v53 = vpack.c.bf16 %v547_v29, %v547_v29  ;;  %v1410_v18 = vrot.slane %v1408_v43, 1  ;;  %v3578_v19 = vld [vmem:[#allocation2 + $0x24] sm:$0xe]  ;;  %v1073_v37 = vld [vmem:[#allocation2 + $0x30] sm:$0xf] }
  0xe5   : > { %1069 = vst.msk [vmem:[#allocation2 + $0x28] sm:$0xf] %vm573_vm2, %v778_v6  ;;  %v846_v9 = vsel %vm3463_vm11, %v838_v44, %v845_v8  ;;  %v1099_v31 = vsel %vm3421_vm6, %v847_v22, %v1098_v57  ;;  %v3575_v63 = vrot.slane %v883_v40, 7  ;;  %v1413_v0 = vshll.u32 %v3564_v36, 16  ;;  %v671_v6 = vld [vmem:[#allocation2 + $0x80] sm:$0x1] }
  0xe6   : > { %1072 = vst [vmem:[#allocation2 + $0x2c] sm:$0x1] %v1071_v11  ;;  %v781_v21 = vshrl.u32 %v701_v53, 16  ;;  %v784_v46 = vshll.u32 %v701_v53, 16  ;;  %v1411_v10 = vor.u32 %v1410_v18, %v1406_v35  ;;  %v654_v14 = vsel %vm3413_vm4, 0, %v653_v27  ;;  %v3732_v24 = vld [vmem:[#allocation2 + $0x6c] sm:$0xff]  }
  0xe7   : > { %1097 = vst.msk [vmem:[#allocation2 + $0x58] sm:$0xf] %vm573_vm2, %v846_v9  ;;  %v888_v44 = vor.u32 %v886_v28, %v3575_v63  ;;  %v889_v58 = vrot.slane %v3575_v63, 4  ;;  %v1415_v29 = vrot.slane %v1413_v0, 1  ;;  %v446_v57 = vpop.f32.mrf.mxu0  ;;  %v523_v43 = vmax.f32 %v464_v23, 0.0 }
  0xe8   : > { %v3585_v8 = vrot.slane %v781_v21, 7  ;;  %1100 = vst [vmem:[#allocation2 + $0x5c] sm:$0x1] %v1099_v31  ;;  %v1115_v22 = vld [vmem:[#allocation2 + $0x78] sm:$0xf]  ;;  %v516_v40 = vmax.f32 %v446_v57, 0.0  ;;  %v466_v18 = vpop.f32.mrf.mxu1 }
  0xe9   : > { %v665_v35 = vld [vmem:[#allocation2 + $0x68] sm:$0x1]  ;;  %v1116_v27 = vsel %vm3449_vm9, %v888_v44, %v1115_v22  ;;  %v1416_v11 = vsel %vm1380_vm7, %v1411_v10, %v1415_v29  ;;  %655 = vst [vmem:[#allocation2 + $0x38] sm:$0x1] %v654_v14  ;;  %v555_v53 = vmul.f32 1.7139589, %v523_v43 }
  0xea   : > { %v610_v28 = vsel %vm3421_vm6, 0, %v609_v34  ;;  %v786_v9 = vor.u32 %v784_v46, %v3585_v8  ;;  %v787_v23 = vrot.slane %v3585_v8, 4  ;;  %1117 = vst [vmem:[#allocation2 + $0x78] sm:$0xf] %v1116_v27  ;;  %1601 = vrot.lane.b32.xlu1 %v1416_v11, %s3116_s26  ;;  %v548_v31 = vmul.f32 1.7139589, %v516_v40  ;;  %v479_v46 = vpop.f32.mrf.mxu2 }
  0xeb   : > { %v528_v0 = vmax.f32 %v476_v12, 0.0  ;;  %v618_v21 = vld [vmem:[#allocation2 + $0x84] sm:$0x1]  ;;  %611 = vst [vmem:[#allocation2 + $0x60] sm:$0x1] %v610_v28  ;;  %v709_v44 = vpack.c.bf16 %v555_v53, %v555_v53  ;;  %v672_v10 = vsel %vm3413_vm4, 0, %v671_v6 }
  0xec   : > { %v1694_v34 = vrot.slane %v2909_v60, 1  ;;  %v1695_v14 = vrot.slane %v3564_v36, 1  ;;  %v1074_v29 = vsel %vm3449_vm9, %v786_v9, %v1073_v37  ;;  %v702_v57 = vpack.c.bf16 %v548_v31, %v548_v31  ;;  %673 = vst [vmem:[#allocation2 + $0x80] sm:$0x1] %v672_v10  ;;  %v3603_v8 = vld [vmem:[#allocation2 + $0x9c] sm:$0x1] }
  0xed   : > { %v560_v43 = vmul.f32 1.7139589, %v528_v0  ;;  %v524_v12 = vmax.f32 %v466_v18, 0.0  ;;  %1075 = vst [vmem:[#allocation2 + $0x30] sm:$0xf] %v1074_v29  ;;  %v849_v22 = vshrl.u32 %v709_v44, 16 }
  0xee   : > { %v852_v40 = vshll.u32 %v709_v44, 16  ;;  %v1696_v6 = vsel %vm1687_vm8, %v1694_v34, %v1695_v14  ;;  %v666_v52 = vsel %vm3413_vm4, 0, %v665_v35  ;;  %v789_v60 = vshrl.u32 %v702_v57, 16 }
  0xef   : > { %v792_v36 = vshll.u32 %v702_v57, 16  ;;  %v714_v27 = vpack.c.bf16 %v560_v43, %v560_v43  ;;  %v556_v11 = vmul.f32 1.7139589, %v524_v12  ;;  %667 = vst [vmem:[#allocation2 + $0x68] sm:$0x1] %v666_v52  ;;  %v851_v37 = vrot.slane %v849_v22, 7 }
  0xf0   : > { %v529_v53 = vmax.f32 %v479_v46, 0.0  ;;  %v619_v28 = vsel %vm3421_vm6, 0, %v618_v21  ;;  %v533_v18 = vmax.f32 %v489_v15, 0.0  ;;  %v791_v9 = vrot.slane %v789_v60, 7  ;;  %v1077_v31 = vld [vmem:[#allocation2 + $0x38] sm:$0x1] }
  0xf1   : > { %v891_v0 = vshrl.u32 %v714_v27, 16  ;;  %v894_v44 = vshll.u32 %v714_v27, 16  ;;  %v710_v10 = vpack.c.bf16 %v556_v11, %v556_v11  ;;  %v854_v34 = vor.u32 %v852_v40, %v851_v37  ;;  %620 = vst [vmem:[#allocation2 + $0x84] sm:$0x1] %v619_v28  ;;  %v3614_v22 = vld [vmem:[#allocation2 + $0x24] sm:$0xff]  }
  0xf2   : > { %v855_v14 = vrot.slane %v851_v37, 4  ;;  %v561_v35 = vmul.f32 1.7139589, %v529_v53  ;;  %v625_v29 = vsel %vm3421_vm6, 0, %v3603_v8  ;;  %v794_v57 = vor.u32 %v792_v36, %v791_v9  ;;  %v1101_v46 = vld [vmem:[#allocation2 + $0x60] sm:$0xf]  ;;  %1746 = vrot.lane.b32.xlu1 %v1696_v6, %s3117_s12 }
  0xf3   : > { %v796_v43 = vrot.slane %v791_v9, 4  ;;  %v893_v12 = vrot.slane %v891_v0, 7  ;;  %v857_v21 = vshrl.u32 %v710_v10, 16  ;;  %v3094_v52 = vld [vmem:[#allocation2 + $0x24] sm:$0xf0]  ;;  %v1102_v40 = vsel %vm3449_vm9, %v854_v34, %v1101_v46  ;;  %v481_v34 = vpop.f32.mrf.mxu2 }
  0xf4   : > { %v1119_v15 = vld [vmem:[#allocation2 + $0x80] sm:$0x1]  ;;  %v860_v60 = vshll.u32 %v710_v10, 16  ;;  %v715_v27 = vpack.c.bf16 %v561_v35, %v561_v35  ;;  %v565_v11 = vmul.f32 1.7139589, %v533_v18  ;;  %v795_v8 = vsel %vm3463_vm11, %v787_v23, %v794_v57 }
  0xf5   : > { %v1078_v36 = vsel %vm3421_vm6, %v796_v43, %v1077_v31  ;;  %1103 = vst [vmem:[#allocation2 + $0x60] sm:$0xf] %v1102_v40  ;;  %v896_v37 = vor.u32 %v894_v44, %v893_v12  ;;  %v898_v6 = vrot.slane %v893_v12, 4  ;;  %v859_v53 = vrot.slane %v857_v21, 7  ;;  %v1203_v0 = vld [vmem:[#allocation2 + $0x2c] sm:$0x1]  ;;  %v491_v12 = vpop.f32.mrf.mxu3 }
  0xf6   : > { %1076 = vst.msk [vmem:[#allocation2 + $0x34] sm:$0xf] %vm573_vm2, %v795_v8  ;;  %v900_v28 = vshrl.u32 %v715_v27, 16  ;;  %v719_v9 = vpack.c.bf16 %v565_v11, %v565_v11  ;;  %v1105_v31 = vld [vmem:[#allocation2 + $0x68] sm:$0x1]  ;;  %v903_v10 = vshll.u32 %v715_v27, 16  ;;  %v1347_v40 = vunpack.c.l.b16 %v1203_v0 }
  0xf7   : > { %1079 = vst [vmem:[#allocation2 + $0x38] sm:$0x1] %v1078_v36  ;;  %v897_v18 = vsel %vm3463_vm11, %v889_v58, %v896_v37  ;;  %v1120_v23 = vsel %vm3421_vm6, %v898_v6, %v1119_v15  ;;  %v674_v44 = vld [vmem:[#allocation2 + $0x8c] sm:$0x1]  ;;  %v862_v35 = vor.u32 %v860_v60, %v859_v53  ;;  %v864_v57 = vrot.slane %v859_v53, 4 }
  0xf8   : > { %1118 = vst.msk [vmem:[#allocation2 + $0x7c] sm:$0xf] %vm573_vm2, %v897_v18  ;;  %v3630_v43 = vrot.slane %v900_v28, 7  ;;  %v934_v46 = vshrl.u32 %v719_v9, 16  ;;  %v1122_v21 = vld [vmem:[#allocation2 + $0x84] sm:$0xf]  ;;  %v3096_v58 = vor.u32 %v3578_v19, %v3094_v52  ;;  %v1365_v6 = vpack.c.b16 %v1347_v40, %v1347_v40 }
  0xf9   : > { %1121 = vst [vmem:[#allocation2 + $0x80] sm:$0x1] %v1120_v23  ;;  %v937_v63 = vshll.u32 %v719_v9, 16  ;;  %v863_v15 = vsel %vm3463_vm11, %v855_v14, %v862_v35  ;;  %v1106_v27 = vsel %vm3421_vm6, %v864_v57, %v1105_v31  ;;  %v680_v8 = vld [vmem:[#allocation2 + $0xa4] sm:$0x1]  ;;  %v1418_v19 = vshrl.u32 %v3614_v22, 16 }
  0xfa   : > { %v905_v11 = vor.u32 %v903_v10, %v3630_v43  ;;  %v906_v60 = vrot.slane %v3630_v43, 4  ;;  %626 = vst [vmem:[#allocation2 + $0x9c] sm:$0x1] %v625_v29  ;;  %v1205_v36 = vld [vmem:[#allocation2 + $0x44] sm:$0x1]  ;;  %v3640_v37 = vrot.slane %v934_v46, 7 }
  0xfb   : > { %1104 = vst.msk [vmem:[#allocation2 + $0x64] sm:$0xf] %vm573_vm2, %v863_v15  ;;  %v1697_v53 = vrot.slane %v3096_v58, 1  ;;  %v1420_v52 = vshll.u32 %v3614_v22, 16  ;;  %v530_v28 = vmax.f32 %v481_v34, 0.0  ;;  %v675_v29 = vsel %vm3413_vm4, 0, %v674_v44 }
  0xfc   : > { %1107 = vst [vmem:[#allocation2 + $0x68] sm:$0x1] %v1106_v27  ;;  %v1123_v14 = vsel %vm3449_vm9, %v905_v11, %v1122_v21  ;;  %v621_v9 = vld [vmem:[#allocation2 + $0x90] sm:$0x1]  ;;  %v939_v0 = vor.u32 %v937_v63, %v3640_v37  ;;  %v940_v18 = vrot.slane %v3640_v37, 4  ;;  %v1698_v23 = vrot.slane %v1365_v6, 1  ;;  %v484_v11 = vpop.f32.mrf.mxu2 }
  0xfd   : > { %1124 = vst [vmem:[#allocation2 + $0x84] sm:$0xf] %v1123_v14  ;;  %v1425_v31 = vshll.u32 %v1365_v6, 16  ;;  %v1422_v10 = vrot.slane %v1420_v52, 1  ;;  %v562_v35 = vmul.f32 1.7139589, %v530_v28  ;;  %v1349_v40 = vunpack.c.l.b16 %v1205_v36 }
  0xfe   : > { %676 = vst [vmem:[#allocation2 + $0x8c] sm:$0x1] %v675_v29  ;;  %v534_v57 = vmax.f32 %v491_v12, 0.0  ;;  %v1699_v46 = vsel %vm1687_vm8, %v1697_v53, %v1698_v23  ;;  %v681_v34 = vsel %vm3413_vm4, 0, %v680_v8  ;;  %v627_v44 = vld [vmem:[#allocation2 + $0xa8] sm:$0x1]  ;;  %v494_v29 = vpop.f32.mrf.mxu3 }
  0xff   : > { %v1427_v21 = vrot.slane %v1425_v31, 1  ;;  %1748 = vrot.lane.b32.xlu1 %v1699_v46, %s3117_s12  ;;  %v1423_v58 = vor.u32 %v1422_v10, %v1418_v19  ;;  %v716_v63 = vpack.c.bf16 %v562_v35, %v562_v35  ;;  %682 = vst [vmem:[#allocation2 + $0xa4] sm:$0x1] %v681_v34  ;;  %v1442_v27 = vshrl.u32 %v3556_v62, 16  ;;  %v2910_v23 = vld [vmem:[#allocation2 + $0x30] sm:$0xf0] }
 0x100   : > { %v566_v15 = vmul.f32 1.7139589, %v534_v57  ;;  %v3655_v14 = vpack.c.b16 %v1349_v40, %v1349_v40  ;;  %v1444_v12 = vshll.u32 %v3556_v62, 16  ;;  %v531_v53 = vmax.f32 %v484_v11, 0.0  ;;  %v1204_v31 = vld [vmem:[#allocation2 + $0x38] sm:$0x1] }
 0x101   : > { %v1136_v6 = vld [vmem:[#allocation2 + $0x9c] sm:$0xf]  ;;  %v622_v8 = vsel %vm3421_vm6, 0, %v621_v9  ;;  %v1428_v19 = vsel %vm1380_vm7, %v1423_v58, %v1427_v21  ;;  %v908_v52 = vshrl.u32 %v716_v63, 16  ;;  %v911_v28 = vshll.u32 %v716_v63, 16 }
 0x102   : > { %v1137_v36 = vsel %vm3449_vm9, %v939_v0, %v1136_v6  ;;  %623 = vst [vmem:[#allocation2 + $0x90] sm:$0x1] %v622_v8  ;;  %1603 = vrot.lane.b32.xlu0 %v1428_v19, %s3116_s26  ;;  %v720_v10 = vpack.c.bf16 %v566_v15, %v566_v15  ;;  %v1446_v35 = vrot.slane %v1444_v12, 1  ;;  %v1449_v57 = vshll.u32 %v3655_v14, 16  ;;  %v2911_v21 = vld [vmem:[#allocation2 + $0x30] sm:$0xe] }
 0x103   : > { %1138 = vst [vmem:[#allocation2 + $0x9c] sm:$0xf] %v1137_v36  ;;  %v563_v46 = vmul.f32 1.7139589, %v531_v53  ;;  %v910_v9 = vrot.slane %v908_v52, 7  ;;  %v535_v34 = vmax.f32 %v494_v29, 0.0  ;;  %v1348_v40 = vunpack.c.l.b16 %v1204_v31 }
 0x104   : > { %v628_v0 = vsel %vm3421_vm6, 0, %v627_v44  ;;  %v942_v63 = vshrl.u32 %v720_v10, 16  ;;  %v945_v11 = vshll.u32 %v720_v10, 16  ;;  %v1447_v6 = vor.u32 %v1446_v35, %v1442_v27  ;;  %v1206_v10 = vld [vmem:[#allocation2 + $0x50] sm:$0x1]  ;;  %v486_v37 = vpop.f32.mrf.mxu2 }
 0x105   : > { %v1126_v58 = vld [vmem:[#allocation2 + $0x8c] sm:$0x1]  ;;  %v1451_v8 = vrot.slane %v1449_v57, 1  ;;  %v913_v36 = vor.u32 %v911_v28, %v910_v9  ;;  %v915_v5 = vrot.slane %v910_v9, 4  ;;  %v717_v19 = vpack.c.bf16 %v563_v46, %v563_v46  ;;  %629 = vst [vmem:[#allocation2 + $0xa8] sm:$0x1] %v628_v0 }
 0x106   : > { %v567_v15 = vmul.f32 1.7139589, %v535_v34  ;;  %v944_v12 = vrot.slane %v942_v63, 7  ;;  %v1140_v42 = vld [vmem:[#allocation2 + $0xa4] sm:$0x1]  ;;  %v1366_v52 = vpack.c.b16 %v1348_v40, %v1348_v40  ;;  %v2912_v29 = vor.u32 %v2911_v21, %v2910_v23  ;;  %v3676_v34 = vld [vmem:[#allocation2 + $0x30] sm:$0xff]  }
 0x107   : > { %v1452_v53 = vsel %vm1380_vm7, %v1447_v6, %v1451_v8  ;;  %v914_v44 = vsel %vm3463_vm11, %v906_v60, %v913_v36  ;;  %v1127_v27 = vsel %vm3421_vm6, %v915_v5, %v1126_v58  ;;  %v917_v28 = vshrl.u32 %v717_v19, 16  ;;  %v2914_v35 = vld [vmem:[#allocation2 + $0x48] sm:$0xe]  ;;  %v677_v6 = vld [vmem:[#allocation2 + $0x98] sm:$0x1] }
 0x108   : > { %1607 = vrot.lane.b32.xlu1 %v1452_v53, %s3116_s26  ;;  %v920_v31 = vshll.u32 %v717_v19, 16  ;;  %1125 = vst.msk [vmem:[#allocation2 + $0x88] sm:$0xf] %vm573_vm2, %v914_v44  ;;  %v947_v57 = vor.u32 %v945_v11, %v944_v12  ;;  %v949_v46 = vrot.slane %v944_v12, 4  ;;  %v721_v23 = vpack.c.bf16 %v567_v15, %v567_v15  ;;  %v1208_v8 = vld [vmem:[#allocation2 + $0x68] sm:$0x1]  ;;  %v496_v12 = vpop.f32.mrf.mxu3 }
 0x109   : > { %v1700_v9 = vrot.slane %v2912_v29, 1  ;;  %1128 = vst [vmem:[#allocation2 + $0x8c] sm:$0x1] %v1127_v27  ;;  %v3678_v43 = vrot.slane %v917_v28, 7  ;;  %v1129_v60 = vld [vmem:[#allocation2 + $0x90] sm:$0xf]  ;;  %v1350_v5 = vunpack.c.l.b16 %v1206_v10  ;;  %v2915_v21 = vor.u32 %v2914_v35, %v2913_v41 }
 0x10a   : > { %v1701_v0 = vrot.slane %v1366_v52, 1  ;;  %v948_v40 = vsel %vm3463_vm11, %v940_v18, %v947_v57  ;;  %v1141_v58 = vsel %vm3421_vm6, %v949_v46, %v1140_v42  ;;  %v951_v63 = vshrl.u32 %v721_v23, 16  ;;  %v3690_v53 = vld [vmem:[#allocation2 + $0x3c] sm:$0xe]  ;;  %v683_v29 = vld [vmem:[#allocation2 + $0xb0] sm:$0x1] }
 0x10b   : > { %v954_v11 = vshll.u32 %v721_v23, 16  ;;  %1139 = vst.msk [vmem:[#allocation2 + $0xa0] sm:$0xf] %vm573_vm2, %v948_v40  ;;  %v922_v36 = vor.u32 %v920_v31, %v3678_v43  ;;  %v923_v19 = vrot.slane %v3678_v43, 4  ;;  %v1368_v15 = vpack.c.b16 %v1350_v5, %v1350_v5 }
 0x10c   : > { %v1702_v41 = vsel %vm1687_vm8, %v1700_v9, %v1701_v0  ;;  %1142 = vst [vmem:[#allocation2 + $0xa4] sm:$0x1] %v1141_v58  ;;  %v3692_v18 = vrot.slane %v951_v63, 7  ;;  %v1706_v42 = vrot.slane %v2915_v21, 1  ;;  %v1352_v44 = vunpack.c.l.b16 %v1208_v8  ;;  %v1143_v28 = vld [vmem:[#allocation2 + $0xa8] sm:$0xf] }
 0x10d   : > { %1750 = vrot.lane.b32.xlu0 %v1702_v41, %s3117_s12  ;;  %v1130_v27 = vsel %vm3449_vm9, %v922_v36, %v1129_v60  ;;  %v1707_v31 = vrot.slane %v1368_v15, 1  ;;  %v1430_v10 = vshrl.u32 %v3676_v34, 16  ;;  %v1432_v35 = vshll.u32 %v3676_v34, 16  ;;  %v3701_v0 = vld [vmem:[#allocation2 + $0x48] sm:$0xff]   ;;  %v3706_v58 = vld [vmem:[#allocation2 + $0x60] sm:$0xff]  }
 0x10e   : > { %1131 = vst [vmem:[#allocation2 + $0x90] sm:$0xf] %v1130_v27  ;;  %v956_v57 = vor.u32 %v954_v11, %v3692_v18  ;;  %v957_v46 = vrot.slane %v3692_v18, 4  ;;  %v1437_v23 = vshll.u32 %v1366_v52, 16  ;;  %v532_v9 = vmax.f32 %v486_v37, 0.0 }
 0x10f   : > { %v1708_v5 = vsel %vm1687_vm8, %v1706_v42, %v1707_v31  ;;  %v1434_v21 = vrot.slane %v1432_v35, 1  ;;  %v678_v60 = vsel %vm3413_vm4, 0, %v677_v6  ;;  %v536_v40 = vmax.f32 %v496_v12, 0.0 }
 0x110   : > { %v1144_v63 = vsel %vm3449_vm9, %v956_v57, %v1143_v28  ;;  %1754 = vrot.lane.b32.xlu1 %v1708_v5, %s3117_s12  ;;  %v1439_v11 = vrot.slane %v1437_v23, 1  ;;  %v564_v8 = vmul.f32 1.7139589, %v532_v9  ;;  %679 = vst [vmem:[#allocation2 + $0x98] sm:$0x1] %v678_v60  ;;  %v684_v52 = vsel %vm3413_vm4, 0, %v683_v29 }
 0x111   : > { %1145 = vst [vmem:[#allocation2 + $0xa8] sm:$0xf] %v1144_v63  ;;  %v1435_v36 = vor.u32 %v1434_v21, %v1430_v10  ;;  %v568_v41 = vmul.f32 1.7139589, %v536_v40  ;;  %v1454_v37 = vshrl.u32 %v3701_v0, 16  ;;  %v1456_v6 = vshll.u32 %v3701_v0, 16  ;;  %v499_v40 = vpop.f32.mrf.mxu3 }
 0x112   : > { %v718_v12 = vpack.c.bf16 %v564_v8, %v564_v8  ;;  %685 = vst [vmem:[#allocation2 + $0xb0] sm:$0x1] %v684_v52  ;;  %v1461_v42 = vshll.u32 %v1368_v15, 16  ;;  %v3715_v27 = vpack.c.b16 %v1352_v44, %v1352_v44  ;;  %v1478_v28 = vshrl.u32 %v3706_v58, 16  ;;  %v630_v63 = vld [vmem:[#allocation2 + $0xb4] sm:$0x1] }
 0x113   : > { %v1440_v31 = vsel %vm1380_vm7, %v1435_v36, %v1439_v11  ;;  %v722_v35 = vpack.c.bf16 %v568_v41, %v568_v41  ;;  %v1458_v57 = vrot.slane %v1456_v6, 1  ;;  %v1480_v29 = vshll.u32 %v3706_v58, 16  ;;  %v3725_v41 = vld [vmem:[#allocation2 + $0x54] sm:$0xff]  }
 0x114   : > { %1605 = vrot.lane.b32.xlu2 %v1440_v31, %s3116_s26  ;;  %v925_v10 = vshrl.u32 %v718_v12, 16  ;;  %v928_v23 = vshll.u32 %v718_v12, 16  ;;  %v1463_v9 = vrot.slane %v1461_v42, 1  ;;  %v1485_v5 = vshll.u32 %v3715_v27, 16  ;;  %v2994_v6 = vld [vmem:[#allocation2 + $0x54] sm:$0xf0] }
 0x115   : > { %v959_v21 = vshrl.u32 %v722_v35, 16  ;;  %v962_v60 = vshll.u32 %v722_v35, 16  ;;  %v1459_v15 = vor.u32 %v1458_v57, %v1454_v37  ;;  %v1482_v44 = vrot.slane %v1480_v29, 1  ;;  %v1207_v37 = vld [vmem:[#allocation2 + $0x5c] sm:$0x1] }
 0x116   : > { %v927_v8 = vrot.slane %v925_v10, 7  ;;  %v1487_v52 = vrot.slane %v1485_v5, 1  ;;  %v2993_v11 = vor.u32 %v3690_v53, %v3558_v26  ;;  %v1704_v36 = vrot.slane %v3655_v14, 1  ;;  %v2995_v53 = vld [vmem:[#allocation2 + $0x54] sm:$0xe] }
 0x117   : > { %v1133_v12 = vld [vmem:[#allocation2 + $0x98] sm:$0x1]  ;;  %v961_v42 = vrot.slane %v959_v21, 7  ;;  %v1464_v31 = vsel %vm1380_vm7, %v1459_v15, %v1463_v9  ;;  %v1483_v51 = vor.u32 %v1482_v44, %v1478_v28  ;;  %v537_v35 = vmax.f32 %v499_v40, 0.0  ;;  %v2997_v28 = vld [vmem:[#allocation2 + $0x6c] sm:$0xf0] }
 0x118   : > { %v930_v57 = vor.u32 %v928_v23, %v927_v8  ;;  %v932_v29 = vrot.slane %v927_v8, 4  ;;  %1609 = vrot.lane.b32.xlu0 %v1464_v31, %s3116_s26  ;;  %v1703_v10 = vrot.slane %v2993_v11, 1  ;;  %v631_v26 = vsel %vm3421_vm6, 0, %v630_v63  ;;  %v1209_v15 = vld [vmem:[#allocation2 + $0x74] sm:$0x1] }
 0x119   : > { %v964_v14 = vor.u32 %v962_v60, %v961_v42  ;;  %v966_v5 = vrot.slane %v961_v42, 4  ;;  %v1147_v50 = vld [vmem:[#allocation2 + $0xb0] sm:$0x1]  ;;  %v1488_v25 = vsel %vm1380_vm7, %v1483_v51, %v1487_v52  ;;  %v569_v21 = vmul.f32 1.7139589, %v537_v35 }
 0x11a   : > { %v931_v23 = vsel %vm3463_vm11, %v923_v19, %v930_v57  ;;  %v1134_v9 = vsel %vm3421_vm6, %v932_v29, %v1133_v12  ;;  %1613 = vrot.lane.b32.xlu1 %v1488_v25, %s3116_s26  ;;  %v1705_v60 = vsel %vm1687_vm8, %v1703_v10, %v1704_v36  ;;  %632 = vst [vmem:[#allocation2 + $0xb4] sm:$0x1] %v631_v26  ;;  %v2998_v44 = vld [vmem:[#allocation2 + $0x6c] sm:$0xe]  ;;  %v1351_v25 = vunpack.c.l.b16 %v1207_v37  ;;  %v501_v12 = vpop.f32.mrf.mxu3  ;;  %v686_v57 = vld [vmem:[#allocation2 + $0xbc] sm:$0x1] }
 0x11b   : > { %1132 = vst.msk [vmem:[#allocation2 + $0x94] sm:$0xf] %vm573_vm2, %v931_v23  ;;  %v965_v51 = vsel %vm3463_vm11, %v957_v46, %v964_v14  ;;  %v1148_v43 = vsel %vm3421_vm6, %v966_v5, %v1147_v50  ;;  %v723_v19 = vpack.c.bf16 %v569_v21, %v569_v21  ;;  %v1353_v8 = vunpack.c.l.b16 %v1209_v15  ;;  %v1211_v15 = vld [vmem:[#allocation2 + $0x8c] sm:$0x1] }
 0x11c   : > { %1135 = vst [vmem:[#allocation2 + $0x98] sm:$0x1] %v1134_v9  ;;  %1752 = vrot.lane.b32.xlu2 %v1705_v60, %s3117_s12  ;;  %v1369_v52 = vpack.c.b16 %v1351_v25, %v1351_v25  ;;  %v2996_v18 = vor.u32 %v2995_v53, %v2994_v6  ;;  %v1466_v36 = vshrl.u32 %v3725_v41, 16  ;;  %v1468_v50 = vshll.u32 %v3725_v41, 16  ;;  %v3758_v9 = vld [vmem:[#allocation2 + $0x84] sm:$0xff]  }
 0x11d   : > { %1146 = vst.msk [vmem:[#allocation2 + $0xac] sm:$0xf] %vm573_vm2, %v965_v51  ;;  %v968_v40 = vshrl.u32 %v723_v19, 16  ;;  %v971_v63 = vshll.u32 %v723_v19, 16  ;;  %v1371_v46 = vpack.c.b16 %v1353_v8, %v1353_v8  ;;  %v2999_v35 = vor.u32 %v2998_v44, %v2997_v28  ;;  %v3760_v60 = vld [vmem:[#allocation2 + $0x84] sm:$0xf0] }
 0x11e   : > { %1149 = vst [vmem:[#allocation2 + $0xb0] sm:$0x1] %v1148_v43  ;;  %v1709_v42 = vrot.slane %v2996_v18, 1  ;;  %v1710_v31 = vrot.slane %v1369_v52, 1  ;;  %v1473_v37 = vshll.u32 %v1369_v52, 16  ;;  %v1470_v6 = vrot.slane %v1468_v50, 1 }
 0x11f   : > { %v3751_v11 = vrot.slane %v968_v40, 7  ;;  %v1716_v14 = vrot.slane %v1371_v46, 1  ;;  %v1715_v5 = vrot.slane %v2999_v35, 1  ;;  %v538_v23 = vmax.f32 %v501_v12, 0.0  ;;  %v2916_v44 = vld [vmem:[#allocation2 + $0x60] sm:$0xf0] }
 0x120   : > { %v1711_v53 = vsel %vm1687_vm8, %v1709_v42, %v1710_v31  ;;  %v1475_v21 = vrot.slane %v1473_v37, 1  ;;  %v1471_v51 = vor.u32 %v1470_v6, %v1466_v36  ;;  %v687_v43 = vsel %vm3413_vm4, 0, %v686_v57  ;;  %v2917_v25 = vld [vmem:[#allocation2 + $0x60] sm:$0xe] }
 0x121   : > { %v973_v29 = vor.u32 %v971_v63, %v3751_v11  ;;  %v974_v10 = vrot.slane %v3751_v11, 4  ;;  %v1150_v26 = vld [vmem:[#allocation2 + $0xb4] sm:$0xf]  ;;  %1756 = vrot.lane.b32.xlu0 %v1711_v53, %s3117_s12  ;;  %v1490_v19 = vshrl.u32 %v3732_v24, 16  ;;  %v1717_v40 = vsel %vm1687_vm8, %v1715_v5, %v1716_v14  ;;  %688 = vst [vmem:[#allocation2 + $0xbc] sm:$0x1] %v687_v43 }
 0x122   : > { %v570_v63 = vmul.f32 1.7139589, %v538_v23  ;;  %v1492_v8 = vshll.u32 %v3732_v24, 16  ;;  %v1497_v52 = vshll.u32 %v1371_v46, 16  ;;  %1760 = vrot.lane.b32.xlu1 %v1717_v40, %s3117_s12  ;;  %v1476_v18 = vsel %vm1380_vm7, %v1471_v51, %v1475_v21  ;;  %v2714_v35 = vld [vmem:[%s4184_s2] sm:$0xf] }
 0x123   : > { %v1151_v28 = vsel %vm3449_vm9, %v973_v29, %v1150_v26  ;;  %v1355_v36 = vunpack.c.l.b16 %v1211_v15  ;;  %v2918_v31 = vor.u32 %v2917_v25, %v2916_v44  ;;  %v2777_v46 = vld [vmem:[%s4184_s2] sm:$0x30]  ;;  %v1713_v57 = vrot.slane %v3715_v27, 1  ;;  %v1598_v29 = vpop.permute.xlu0 %1597  ;;  %v2736_v26 = vld [vmem:[%s4184_s2 + $0x10] sm:$0xf]  ;;  %v504_v25 = vpop.f32.mrf.mxu3 }
 0x124   : > { %1152 = vst [vmem:[#allocation2 + $0xb4] sm:$0xf] %v1151_v28  ;;  %1611 = vrot.lane.b32.xlu2 %v1476_v18, %s3116_s26  ;;  %v724_v50 = vpack.c.bf16 %v570_v63, %v570_v63  ;;  %v1494_v12 = vrot.slane %v1492_v8, 1  ;;  %v1499_v42 = vrot.slane %v1497_v52, 1  ;;  %v2779_v14 = vld [vmem:[%s4184_s2 + $0x10] sm:$0x30]  ;;  %v2715_v43 = vor.u32 %v2777_v46, %v2714_v35 }
 0x125   : > { %v3779_v37 = vpack.c.b16 %v1355_v36, %v1355_v36  ;;  %v1712_v21 = vrot.slane %v2918_v31, 1  ;;  %v2919_v23 = vld [vmem:[#allocation2 + $0x78] sm:$0xf0]  ;;  %v1210_v15 = vld [vmem:[#allocation2 + $0x80] sm:$0x1]  ;;  %v1514_v28 = vshrl.u32 %v3758_v9, 16 }
 0x126   : > { %v976_v6 = vshrl.u32 %v724_v50, 16  ;;  %v979_v53 = vshll.u32 %v724_v50, 16  ;;  %v1495_v5 = vor.u32 %v1494_v12, %v1490_v19  ;;  %v1516_v27 = vshll.u32 %v3758_v9, 16  ;;  %v2920_v44 = vld [vmem:[#allocation2 + $0x78] sm:$0xe]  ;;  %v2986_v12 = vld [vmem:[#allocation2] sm:$0xff]  }
 0x127   : > { %v1521_v51 = vshll.u32 %v3779_v37, 16  ;;  %v1714_v8 = vsel %vm1687_vm8, %v1712_v21, %v1713_v57  ;;  %v633_v52 = vld [vmem:[#allocation2 + $0xc0] sm:$0x1]  ;;  %v2694_v19 = vld [vmem:[%s4184_s2 + $0x8] sm:$0xf]  ;;  %v1996_v50 = vsel %vm1895_vm12, %v2715_v43, 0  ;;  %v1780_v31 = vsel %vm1778_vm13, %v2986_v12, %v1598_v29 }
 0x128   : > { %v978_v40 = vrot.slane %v976_v6, 7  ;;  %v1500_v63 = vsel %vm1380_vm7, %v1495_v5, %v1499_v42  ;;  %v1518_v18 = vrot.slane %v1516_v27, 1  ;;  %v2778_v42 = vld [vmem:[%s4184_s2 + $0x8] sm:$0x30]  ;;  %v1154_v57 = vld [vmem:[#allocation2 + $0xbc] sm:$0x1]  ;;  %2005 = vmatpush.bf16.msrb.mxu2 %v1996_v50  ;;  %v2737_v6 = vor.u32 %v2779_v14, %v2736_v26 }
 0x129   : > { %1615 = vrot.lane.b32.xlu0 %v1500_v63, %s3116_s26  ;;  %v1523_v36 = vrot.slane %v1521_v51, 1  ;;  %v1354_v5 = vunpack.c.l.b16 %v1210_v15  ;;  %v2923_v21 = vld [vmem:[#allocation2 + $0x90] sm:$0xe]  ;;  %v2921_v63 = vor.u32 %v2920_v44, %v2919_v23  ;;  %v539_v27 = vmax.f32 %v504_v25, 0.0  ;;  %v2922_v43 = vld [vmem:[#allocation2 + $0x90] sm:$0xf0] }
 0x12a   : > { %v981_v35 = vor.u32 %v979_v53, %v978_v40  ;;  %v983_v46 = vrot.slane %v978_v40, 4  ;;  %v1519_v4 = vor.u32 %v1518_v18, %v1514_v28  ;;  %v634_v51 = vsel %vm3421_vm6, 0, %v633_v52  ;;  %v1212_v3 = vld [vmem:[#allocation2 + $0x98] sm:$0x1] }
 0x12b   : > { %v2098_v26 = vsel %vm1895_vm12, %v2737_v6, 0  ;;  %v1372_v14 = vpack.c.b16 %v1354_v5, %v1354_v5  ;;  %635 = vst [vmem:[#allocation2 + $0xc0] sm:$0x1] %v634_v51  ;;  %v3812_v23 = vld [vmem:[#allocation2 + $0x78] sm:$0xff]   ;;  %v1718_v11 = vrot.slane %v2921_v63, 1  ;;  %v2695_v44 = vor.u32 %v2778_v42, %v2694_v19  ;;  %v3821_v42 = vld [vmem:[#allocation2 + $0x90] sm:$0xff]   ;;  %v506_v63 = vpop.f32.mrf.mxu3 }
 0x12c   : > { %v982_v29 = vsel %vm3463_vm11, %v974_v10, %v981_v35  ;;  %v1155_v53 = vsel %vm3421_vm6, %v983_v46, %v1154_v57  ;;  %1758 = vrot.lane.b32.xlu2 %v1714_v8, %s3117_s12  ;;  %v1524_v15 = vsel %vm1380_vm7, %v1519_v4, %v1523_v36  ;;  %2107 = vmatpush.bf16.msrb.mxu3 %v2098_v26  ;;  %v571_v28 = vmul.f32 1.7139589, %v539_v27  ;;  %v1743_v35 = vpop.permute.xlu0 %1742  ;;  %v689_v46 = vld [vmem:[#allocation2 + $0xc8] sm:$0x1]  ;;  %v1214_v27 = vld [vmem:[#allocation2 + $0xb0] sm:$0x1] }
 0x12d   : > { %1153 = vst.msk [vmem:[#allocation2 + $0xb8] sm:$0xf] %vm573_vm2, %v982_v29  ;;  %1619 = vrot.lane.b32.xlu1 %v1524_v15, %s3116_s26  ;;  %v1719_v10 = vrot.slane %v1372_v14, 1  ;;  %v1356_v25 = vunpack.c.l.b16 %v1212_v3  ;;  %v2924_v40 = vor.u32 %v2923_v21, %v2922_v43  ;;  %v1502_v8 = vshrl.u32 %v3812_v23, 16 }
 0x12e   : > { %1156 = vst [vmem:[#allocation2 + $0xbc] sm:$0x1] %v1155_v53  ;;  %v725_v52 = vpack.c.bf16 %v571_v28, %v571_v28  ;;  %v1897_v18 = vsel %vm1895_vm12, %v2695_v44, 0  ;;  %v1504_v50 = vshll.u32 %v3812_v23, 16  ;;  %v1509_v12 = vshll.u32 %v1372_v14, 16 }
 0x12f   : > { %v1720_v4 = vsel %vm1687_vm8, %v1718_v11, %v1719_v10  ;;  %1906 = vmatpush.bf16.msrb.mxu1 %v1897_v18  ;;  %v1374_v36 = vpack.c.b16 %v1356_v25, %v1356_v25  ;;  %v1724_v19 = vrot.slane %v2924_v40, 1  ;;  %v1817_v43 = vsel %vm1815_vm14, %v1780_v31, %v1743_v35  ;;  %v3001_v11 = vld [vmem:[#allocation2 + $0x84] sm:$0xe]  ;;  %v3833_v31 = vld [vmem:[#allocation2 + $0xa8] sm:$0xff]  }
 0x130   : > { %v985_v57 = vshrl.u32 %v725_v52, 16  ;;  %v988_v6 = vshll.u32 %v725_v52, 16  ;;  %v1506_v5 = vrot.slane %v1504_v50, 1  ;;  %v1511_v21 = vrot.slane %v1509_v12, 1  ;;  %2716 = vmatmul.msk.bf16.vlgmr.msrb.gmra.mxu2 %vm1862_vm15, %v1817_v43 }
 0x131   : > { %v1600_v3 = vpop.permute.xlu2 %1599  ;;  %1762 = vrot.lane.b32.xlu0 %v1720_v4, %s3117_s12  ;;  %v1725_v51 = vrot.slane %v1374_v36, 1  ;;  %v1526_v29 = vshrl.u32 %v3821_v42, 16  ;;  %v1528_v14 = vshll.u32 %v3821_v42, 16  ;;  %v1533_v15 = vshll.u32 %v1374_v36, 16 }
 0x132   : > { %v3826_v53 = vrot.slane %v985_v57, 7  ;;  %v1507_v26 = vor.u32 %v1506_v5, %v1502_v8  ;;  %v1157_v28 = vld [vmem:[#allocation2 + $0xc0] sm:$0xf]  ;;  %v540_v10 = vmax.f32 %v506_v63, 0.0  ;;  %v690_v25 = vsel %vm3413_vm4, 0, %v689_v46 }
 0x133   : > { %v1726_v44 = vsel %vm1687_vm8, %v1724_v19, %v1725_v51  ;;  %v1358_v40 = vunpack.c.l.b16 %v1214_v27  ;;  %v1530_v50 = vrot.slane %v1528_v14, 1  ;;  %691 = vst [vmem:[#allocation2 + $0xc8] sm:$0x1] %v690_v25  ;;  %v1535_v12 = vrot.slane %v1533_v15, 1  ;;  %v3843_v19 = vld [vmem:[#allocation2 + $0x9c] sm:$0xff]  }
 0x134   : > { %v990_v52 = vor.u32 %v988_v6, %v3826_v53  ;;  %v991_v8 = vrot.slane %v3826_v53, 4  ;;  %v1512_v18 = vsel %vm1380_vm7, %v1507_v26, %v1511_v21  ;;  %v572_v35 = vmul.f32 1.7139589, %v540_v10  ;;  %v3003_v46 = vld [vmem:[#allocation2 + $0x9c] sm:$0xf0] }
 0x135   : > { %1766 = vrot.lane.b32.xlu1 %v1726_v44, %s3117_s12  ;;  %1617 = vrot.lane.b32.xlu2 %v1512_v18, %s3116_s26  ;;  %v3840_v4 = vpack.c.b16 %v1358_v40, %v1358_v40  ;;  %v1550_v36 = vshrl.u32 %v3833_v31, 16  ;;  %v1531_v6 = vor.u32 %v1530_v50, %v1526_v29  ;;  %v1552_v5 = vshll.u32 %v3833_v31, 16  ;;  %v1213_v21 = vld [vmem:[#allocation2 + $0xa4] sm:$0x1]  ;;  %v3004_v53 = vld [vmem:[#allocation2 + $0x9c] sm:$0xe] }
 0x136   : > { %v1158_v57 = vsel %vm3449_vm9, %v990_v52, %v1157_v28  ;;  %v726_v63 = vpack.c.bf16 %v572_v35, %v572_v35  ;;  %v1722_v51 = vrot.slane %v3779_v37, 1  ;;  %v1782_v43 = vsel %vm1778_vm13, %v3499_v54, %v1600_v3  ;;  %v3854_v29 = vld [vmem:[#allocation2 + $0xb4] sm:$0xff]   ;;  %v1215_v35 = vld [vmem:[#allocation2 + $0xbc] sm:$0x1] }
 0x137   : > { %1159 = vst [vmem:[#allocation2 + $0xc0] sm:$0xf] %v1158_v57  ;;  %v1557_v27 = vshll.u32 %v3840_v4, 16  ;;  %v1536_v26 = vsel %vm1380_vm7, %v1531_v6, %v1535_v12  ;;  %v1554_v14 = vrot.slane %v1552_v5, 1  ;;  %v3002_v49 = vor.u32 %v3001_v11, %v3760_v60  ;;  %v3006_v28 = vld [vmem:[#allocation2 + $0xb4] sm:$0xf0] }
 0x138   : > { %v993_v44 = vshrl.u32 %v726_v63, 16  ;;  %v996_v10 = vshll.u32 %v726_v63, 16  ;;  %v1357_v52 = vunpack.c.l.b16 %v1213_v21  ;;  %v3005_v12 = vor.u32 %v3004_v53, %v3003_v46  ;;  %v3007_v21 = vld [vmem:[#allocation2 + $0xb4] sm:$0xe] }
 0x139   : > { %v1745_v15 = vpop.permute.xlu2 %1744  ;;  %1621 = vrot.lane.b32.xlu0 %v1536_v26, %s3116_s26  ;;  %v1559_v25 = vrot.slane %v1557_v27, 1  ;;  %v1555_v40 = vor.u32 %v1554_v14, %v1550_v36  ;;  %v1721_v37 = vrot.slane %v3002_v49, 1  ;;  %v1538_v36 = vshrl.u32 %v3843_v19, 16  ;;  %v2925_v14 = vld [vmem:[#allocation2 + $0xa8] sm:$0xf0] }
 0x13a   : > { %v995_v18 = vrot.slane %v993_v44, 7  ;;  %v1819_v54 = vsel %vm1815_vm14, %v1782_v43, %v1745_v15  ;;  %v1161_v3 = vld [vmem:[#allocation2 + $0xc8] sm:$0x1]  ;;  %v1375_v11 = vpack.c.b16 %v1357_v52, %v1357_v52  ;;  %v1540_v5 = vshll.u32 %v3843_v19, 16  ;;  %v2926_v49 = vld [vmem:[#allocation2 + $0xa8] sm:$0xe] }
 0x13b   : > { %v1560_v50 = vsel %vm1380_vm7, %v1555_v40, %v1559_v25  ;;  %v1723_v60 = vsel %vm1687_vm8, %v1721_v37, %v1722_v51  ;;  %2696 = vmatmul.msk.bf16.vlgmr.msrb.gmra.mxu1 %vm1862_vm15, %v1819_v54  ;;  %v1727_v63 = vrot.slane %v3005_v12, 1  ;;  %v1359_v26 = vunpack.c.l.b16 %v1215_v35 }
 0x13c   : > { %v998_v57 = vor.u32 %v996_v10, %v995_v18  ;;  %v1000_v6 = vrot.slane %v995_v18, 4  ;;  %v1728_v27 = vrot.slane %v1375_v11, 1  ;;  %v1545_v43 = vshll.u32 %v1375_v11, 16 }
 0x13d   : > { %1625 = vrot.lane.b32.xlu1 %v1560_v50, %s3116_s26  ;;  %1764 = vrot.lane.b32.xlu2 %v1723_v60, %s3117_s12  ;;  %v1542_v53 = vrot.slane %v1540_v5, 1  ;;  %v1377_v25 = vpack.c.b16 %v1359_v26, %v1359_v26  ;;  %v1562_v59 = vshrl.u32 %v3854_v29, 16  ;;  %v3008_v40 = vor.u32 %v3007_v21, %v3006_v28 }
 0x13e   : > { %v999_v46 = vsel %vm3463_vm11, %v991_v8, %v998_v57  ;;  %v1162_v51 = vsel %vm3421_vm6, %v1000_v6, %v1161_v3  ;;  %v1729_v15 = vsel %vm1687_vm8, %v1727_v63, %v1728_v27  ;;  %v1547_v44 = vrot.slane %v1545_v43, 1  ;;  %v2929_v12 = vld [vmem:[#allocation2 + $0xc0] sm:$0xe] }
 0x13f   : > { %1160 = vst.msk [vmem:[#allocation2 + $0xc4] sm:$0xf] %vm573_vm2, %v999_v46  ;;  %v1543_v10 = vor.u32 %v1542_v53, %v1538_v36  ;;  %v1564_v8 = vshll.u32 %v3854_v29, 16  ;;  %v2927_v37 = vor.u32 %v2926_v49, %v2925_v14  ;;  %v1569_v18 = vshll.u32 %v1377_v25, 16 }
 0x140   : > { %1163 = vst [vmem:[#allocation2 + $0xc8] sm:$0x1] %v1162_v51  ;;  %2717 = vmatmul.msk.bf16.gmra.mxu2 %vm1862_vm15, %v1819_v54  ;;  %v1734_v3 = vrot.slane %v1377_v25, 1  ;;  %v1733_v60 = vrot.slane %v3008_v40, 1  ;;  %v1731_v6 = vrot.slane %v3840_v4, 1 }
 0x141   : > { %1768 = vrot.lane.b32.xlu0 %v1729_v15, %s3117_s12  ;;  %v1548_v52 = vsel %vm1380_vm7, %v1543_v10, %v1547_v44  ;;  %v1566_v50 = vrot.slane %v1564_v8, 1  ;;  %v1571_v11 = vrot.slane %v1569_v18, 1  ;;  %v1730_v54 = vrot.slane %v2927_v37, 1  ;;  %v2987_v8 = vld [vmem:[#allocation2 + $0x18] sm:$0xff]  }
 0x142   : > { %v1735_v57 = vsel %vm1687_vm8, %v1733_v60, %v1734_v3 }
 0x143   : > { %v1567_v35 = vor.u32 %v1566_v50, %v1562_v59  ;;  %v1732_v43 = vsel %vm1687_vm8, %v1730_v54, %v1731_v6 }
 0x145   : > { %1623 = vrot.lane.b32.xlu2 %v1548_v52, %s3116_s26  ;;  %1772 = vrot.lane.b32.xlu1 %v1735_v57, %s3117_s12  ;;  %v1572_v36 = vsel %vm1380_vm7, %v1567_v35, %v1571_v11 }
 0x146   : > { %v2928_v28 = vld [vmem:[#allocation2 + $0xc0] sm:$0xf0] }
 0x147   : > { %v1216_v5 = vld [vmem:[#allocation2 + $0xc8] sm:$0x1]  ;;  %v2930_v21 = vor.u32 %v2929_v12, %v2928_v28  ;;  %v3882_v27 = vld [vmem:[#allocation2 + $0xc0] sm:$0xff]  }
 0x148   : > { %v1360_v63 = vunpack.c.l.b16 %v1216_v5  ;;  %v1576_v46 = vshll.u32 %v3882_v27, 16  ;;  %v1574_v4 = vshrl.u32 %v3882_v27, 16 }
 0x149   : > { %1627 = vrot.lane.b32.xlu0 %v1572_v36, %s3116_s26  ;;  %v1736_v53 = vrot.slane %v2930_v21, 1  ;;  %v2301_v36 = vld [vmem:[%s4185_s3] sm:$0x3] }
 0x14a   : > { %v1378_v51 = vpack.c.b16 %v1360_v63, %v1360_v63  ;;  %v1578_v26 = vrot.slane %v1576_v46, 1  ;;  %v2352_v5 = vsel %vm2350_vm0, %v2301_v36, 0 }
 0x14b   : > { %2361 = vmatpush.bf16.msrb.mxu0 %v2352_v5 }
 0x14c   : > { %v1737_v14 = vrot.slane %v1378_v51, 1  ;;  %v1581_v49 = vshll.u32 %v1378_v51, 16  ;;  %v1579_v15 = vor.u32 %v1578_v26, %v1574_v4  ;;  %v692_v4 = vld [vmem:[#allocation2 + $0xd4] sm:$0x1] }
 0x14d   : > { %1770 = vrot.lane.b32.xlu2 %v1732_v43, %s3117_s12 }
 0x14e   : > { %v1738_v44 = vsel %vm1687_vm8, %v1736_v53, %v1737_v14  ;;  %v1583_v10 = vrot.slane %v1581_v49, 1  ;;  %v693_v14 = vsel %vm3413_vm4, 0, %v692_v4 }
 0x14f   : > { %694 = vst [vmem:[#allocation2 + $0xd4] sm:$0x1] %v693_v14 }
 0x150   : > { %v1584_v25 = vsel %vm1380_vm7, %v1579_v15, %v1583_v10  ;;  %v3009_v15 = vld [vmem:[#allocation2 + $0xcc] sm:$0xf0] }
 0x151   : > { %1774 = vrot.lane.b32.xlu0 %v1738_v44, %s3117_s12 }
 0x155   : > { %1629 = vrot.lane.b32.xlu2 %v1584_v25, %s3116_s26 }
 0x156   : > { %v1217_v44 = vld [vmem:[#allocation2 + $0xd4] sm:$0x1] }
 0x15c   : > { %v1602_v59 = vpop.permute.xlu1 %1601 }
 0x15d   : > { %v1784_v40 = vsel %vm1778_vm13, %v2987_v8, %v1602_v59  ;;  %v1361_v59 = vunpack.c.l.b16 %v1217_v44 }
 0x164   : > { %v1747_v37 = vpop.permute.xlu1 %1746 }
 0x165   : > { %v1821_v52 = vsel %vm1815_vm14, %v1784_v40, %v1747_v37  ;;  %v1379_v40 = vpack.c.b16 %v1361_v59, %v1361_v59 }
 0x166   : > { %2697 = vmatmul.msk.bf16.gmra.mxu1 %vm1862_vm15, %v1821_v52  ;;  %2718 = vmatmul.msk.bf16.gmra.mxu2 %vm1862_vm15, %v1821_v52 }
 0x167   : > { %2738 = vmatmul.msk.bf16.vlgmr.msrb.gmra.mxu3 %vm1862_vm15, %v1821_v52  ;;  %v1593_v52 = vshll.u32 %v1379_v40, 16 }
 0x16e   : > { %v1606_v11 = vpop.permute.xlu2 %1605 }
 0x16f   : > { %v1788_v35 = vsel %vm1778_vm13, %v3676_v34, %v1606_v11 }
 0x171   : > { %v1749_v3 = vpop.permute.xlu1 %1748 }
 0x174   : > { %v1604_v18 = vpop.permute.xlu0 %1603 }
 0x175   : > { %v1786_v50 = vsel %vm1778_vm13, %v3614_v22, %v1604_v18 }
 0x176   : > { %v1823_v60 = vsel %vm1815_vm14, %v1786_v50, %v1749_v3  ;;  %v1753_v6 = vpop.permute.xlu2 %1752  ;;  %v1595_v3 = vrot.slane %v1593_v52, 1 }
 0x177   : > { %2698 = vmatmul.msk.bf16.gmra.mxu1 %vm1862_vm15, %v1823_v60  ;;  %2719 = vmatmul.msk.bf16.gmra.mxu2 %vm1862_vm15, %v1823_v60 }
 0x178   : > { %2739 = vmatmul.msk.bf16.gmra.mxu3 %vm1862_vm15, %v1823_v60 }
 0x17a   : > { %v1608_v22 = vpop.permute.xlu1 %1607 }
 0x17b   : > { %v1790_v54 = vsel %vm1778_vm13, %v3556_v62, %v1608_v22 }
 0x17c   : > { %v1827_v28 = vsel %vm1815_vm14, %v1790_v54, %v1753_v6 }
 0x17e   : > { %v1612_v43 = vpop.permute.xlu2 %1611 }
 0x17f   : > { %v1751_v12 = vpop.permute.xlu0 %1750  ;;  %v1794_v51 = vsel %vm1778_vm13, %v3725_v41, %v1612_v43 }
 0x180   : > { %v1825_v57 = vsel %vm1815_vm14, %v1788_v35, %v1751_v12 }
 0x182   : > { %v1755_v21 = vpop.permute.xlu1 %1754 }
 0x186   : > { %v1759_v8 = vpop.permute.xlu2 %1758 }
 0x187   : > { %2699 = vmatmul.msk.bf16.gmra.mxu1 %vm1862_vm15, %v1825_v57  ;;  %2720 = vmatmul.msk.bf16.gmra.mxu2 %vm1862_vm15, %v1825_v57 }
 0x188   : > { %2740 = vmatmul.msk.bf16.gmra.mxu3 %vm1862_vm15, %v1825_v57 }
 0x18a   : > { %v1610_v34 = vpop.permute.xlu0 %1609 }
 0x18b   : > { %v1792_v62 = vsel %vm1778_vm13, %v3701_v0, %v1610_v34  ;;  %v636_v0 = vld [vmem:[#allocation2 + $0xcc] sm:$0x1] }
 0x18c   : > { %v1829_v63 = vsel %vm1815_vm14, %v1792_v62, %v1755_v21  ;;  %v637_v26 = vsel %vm3421_vm6, 0, %v636_v0  ;;  %v1614_v49 = vpop.permute.xlu1 %1613 }
 0x18d   : > { %638 = vst [vmem:[#allocation2 + $0xcc] sm:$0x1] %v637_v26  ;;  %v1796_v10 = vsel %vm1778_vm13, %v3706_v58, %v1614_v49 }
 0x18e   : > { %v1833_v39 = vsel %vm1815_vm14, %v1796_v10, %v1759_v8 }
 0x18f   : > { %v1618_v36 = vpop.permute.xlu2 %1617 }
 0x193   : > { %v1757_v46 = vpop.permute.xlu0 %1756 }
 0x194   : > { %v1831_v53 = vsel %vm1815_vm14, %v1794_v51, %v1757_v46  ;;  %v3934_v41 = vld [vmem:[#allocation2 + $0xcc] sm:$0xff]   ;;  %v1761_v57 = vpop.permute.xlu1 %1760 }
 0x195   : > { %v1586_v37 = vshrl.u32 %v3934_v41, 16  ;;  %v1588_v32 = vshll.u32 %v3934_v41, 16 }
 0x197   : > { %2700 = vmatmul.msk.bf16.gmra.mxu1 %vm1862_vm15, %v1827_v28  ;;  %2721 = vmatmul.msk.bf16.gmra.mxu2 %vm1862_vm15, %v1827_v28  ;;  %v1590_v18 = vrot.slane %v1588_v32, 1 }
 0x198   : > { %2741 = vmatmul.msk.bf16.gmra.mxu3 %vm1862_vm15, %v1827_v28  ;;  %v3010_v28 = vld [vmem:[#allocation2 + $0xcc] sm:$0xe] }
 0x199   : > { %v1591_v58 = vor.u32 %v1590_v18, %v1586_v37  ;;  %v3011_v21 = vor.u32 %v3010_v28, %v3009_v15 }
 0x19b   : > { %v1596_v50 = vsel %vm1380_vm7, %v1591_v58, %v1595_v3  ;;  %v1616_v11 = vpop.permute.xlu0 %1615  ;;  %v1739_v43 = vrot.slane %v3011_v21, 1 }
 0x19c   : > { %1631 = vrot.lane.b32.xlu1 %v1596_v50, %s3116_s26  ;;  %v1798_v35 = vsel %vm1778_vm13, %v3732_v24, %v1616_v11  ;;  %v1800_v24 = vsel %vm1778_vm13, %v3812_v23, %v1618_v36 }
 0x19d   : > { %v1835_v22 = vsel %vm1815_vm14, %v1798_v35, %v1761_v57 }
 0x19f   : > { %v1620_v49 = vpop.permute.xlu1 %1619 }
 0x1a0   : > { %v1802_v10 = vsel %vm1778_vm13, %v3758_v9, %v1620_v49 }
 0x1a3   : > { %v1763_v5 = vpop.permute.xlu0 %1762 }
 0x1a4   : > { %v1837_v46 = vsel %vm1815_vm14, %v1800_v24, %v1763_v5 }
 0x1a7   : > { %2701 = vmatmul.msk.bf16.gmra.mxu1 %vm1862_vm15, %v1829_v63  ;;  %2722 = vmatmul.msk.bf16.gmra.mxu2 %vm1862_vm15, %v1829_v63  ;;  %v1767_v5 = vpop.permute.xlu1 %1766 }
 0x1a8   : > { %2742 = vmatmul.msk.bf16.gmra.mxu3 %vm1862_vm15, %v1829_v63  ;;  %v1740_v63 = vrot.slane %v1379_v40, 1 }
 0x1aa   : > { %v1741_v51 = vsel %vm1687_vm8, %v1739_v43, %v1740_v63 }
 0x1ab   : > { %1776 = vrot.lane.b32.xlu2 %v1741_v51, %s3117_s12  ;;  %s4012_s12 = scalar_lea.vmem [#allocation6], %s2668_s8  ;;  %s2780_s8 = sshll.u32 %s3165_s19, 7 }
 0x1ac   : > { %s2584_s23 = scalar_lea.hbm %s4186_s4, %s2780_s8  ;;  %s2585_s25 = sshll.u32 %s4012_s12, 4  ;;  %s2586_s25 = int_to_ptr.vmem [resolvable:$true] %s2585_s25 }
 0x1ad   : > { %s2587_s30 = sshll.u32 %s2584_s23, 4  ;;  %s2573_s19 = scalar_lea.sflag [#allocation5], %s3230_s7  ;;  %s2588_s30 = int_to_ptr.hbm [resolvable:$true] %s2587_s30 }
 0x1ae   : > { %s3056_s5 = sshra.s32 %s2588_s30, 4  ;;  %s3057_s5 = int_to_ptr.hbm [resolvable:$true] %s3056_s5 }
 0x1af   : > { %s3058_s29 = scalar_lea.hbm %s3057_s5, 128  ;;  %p3063_p0 = scmp.lt.s32.totalorder %s3057_s5, %s4186_s4 }
 0x1b0   : > { %p3059_p6 = scmp.ne.s32.totalorder %s3057_s5, %s3058_s29  ;;  %p3064_p1 = scmp.lt.s32.totalorder %s3062_s14, %s3058_s29 }
 0x1b2   : > { %p3060_p9 = pnand %p3059_p6, %p3194_p11  ;;  %p3065_p3 = por %p3064_p1, %p3063_p0 }
 0x1b3   : > { %v2007_v25 = vpop.f32.mrf.mxu2 }
 0x1b4   : > { %p3061_p13 = pneg %p3060_p9 }
 0x1b6   : > { %p3066_p4 = pnand %p3065_p3, %p3061_p13 }
 0x1b7   : > { %2702 = vmatmul.msk.bf16.gmra.mxu1 %vm1862_vm15, %v1831_v53  ;;  %2723 = vmatmul.msk.bf16.gmra.mxu2 %vm1862_vm15, %v1831_v53 }
 0x1b8   : > { %2743 = vmatmul.msk.bf16.gmra.mxu3 %vm1862_vm15, %v1831_v53  ;;  %v1908_v12 = vpop.f32.mrf.mxu1 }
 0x1b9   : > { %v2008_v26 = vadd.f32 %v2007_v25, %v1908_v12 }
 0x1bb   : > { %v2009_v60 = vpop.f32.mrf.mxu2 }
 0x1c0   : > { %v1910_v6 = vpop.f32.mrf.mxu1 }
 0x1c1   : > { %v2010_v23 = vadd.f32 %v2009_v60, %v1910_v6  ;;  %v1622_v60 = vpop.permute.xlu0 %1621 }
 0x1c2   : > { %v1804_v57 = vsel %vm1778_vm13, %v3821_v42, %v1622_v60 }
 0x1c3   : > { %v2012_v54 = vpop.f32.mrf.mxu2  ;;  %v1841_v63 = vsel %vm1815_vm14, %v1804_v57, %v1767_v5 }
 0x1c7   : > { %2703 = vmatmul.msk.bf16.gmra.mxu1 %vm1862_vm15, %v1833_v39  ;;  %2724 = vmatmul.msk.bf16.gmra.mxu2 %vm1862_vm15, %v1833_v39 }
 0x1c8   : > { %2744 = vmatmul.msk.bf16.gmra.mxu3 %vm1862_vm15, %v1833_v39  ;;  %v1765_v39 = vpop.permute.xlu2 %1764 }
 0x1c9   : > { %v1839_v32 = vsel %vm1815_vm14, %v1802_v10, %v1765_v39 }
 0x1cb   : > { %v2014_v34 = vpop.f32.mrf.mxu2 }
 0x1d7   : > { %2704 = vmatmul.msk.bf16.gmra.mxu1 %vm1862_vm15, %v1835_v22  ;;  %2725 = vmatmul.msk.bf16.gmra.mxu2 %vm1862_vm15, %v1835_v22 }
 0x1d8   : > { %2745 = vmatmul.msk.bf16.gmra.mxu3 %vm1862_vm15, %v1835_v22 }
 0x1e3   : > { %v1913_v62 = vpop.f32.mrf.mxu1 }
 0x1e4   : > { %v2013_v50 = vadd.f32 %v2012_v54, %v1913_v62 }
 0x1e7   : > { %2705 = vmatmul.msk.bf16.gmra.mxu1 %vm1862_vm15, %v1837_v46  ;;  %2726 = vmatmul.msk.bf16.gmra.mxu2 %vm1862_vm15, %v1837_v46 }
 0x1e8   : > { %2746 = vmatmul.msk.bf16.gmra.mxu3 %vm1862_vm15, %v1837_v46 }
 0x1e9   : > { %v2017_v53 = vpop.f32.mrf.mxu2 }
 0x1ea   : > { %v2109_v0 = vpop.f32.mrf.mxu3 }
 0x1eb   : > { %v1915_v4 = vpop.f32.mrf.mxu1  ;;  %v2189_v14 = vadd.f32 %v2109_v0, %v2008_v26  ;;  %v1624_v0 = vpop.permute.xlu2 %1623 }
 0x1ec   : > { %v2015_v12 = vadd.f32 %v2014_v34, %v1915_v4 }
 0x1ed   : > { %v2221_v59 = vmax.f32 %v2189_v14, 0.0  ;;  %v1769_v14 = vpop.permute.xlu0 %1768 }
 0x1ef   : > { %v2253_v52 = vmul.f32 1.7139589, %v2221_v59  ;;  %v1806_v59 = vsel %vm1778_vm13, %v3843_v19, %v1624_v0 }
 0x1f1   : > { %v2019_v15 = vpop.f32.mrf.mxu2 }
 0x1f2   : > { %v2111_v44 = vpop.f32.mrf.mxu3 }
 0x1f3   : > { %v2190_v8 = vadd.f32 %v2111_v44, %v2010_v23  ;;  %v1771_v60 = vpop.permute.xlu2 %1770 }
 0x1f4   : > { %v1918_v40 = vpop.f32.mrf.mxu1 }
 0x1f5   : > { %v2222_v37 = vmax.f32 %v2190_v8, 0.0  ;;  %v2018_v46 = vadd.f32 %v2017_v53, %v1918_v40  ;;  %v1843_v8 = vsel %vm1815_vm14, %v1806_v59, %v1769_v14 }
 0x1f7   : > { %v2254_v18 = vmul.f32 1.7139589, %v2222_v37  ;;  %2706 = vmatmul.msk.bf16.gmra.mxu1 %vm1862_vm15, %v1839_v32  ;;  %2727 = vmatmul.msk.bf16.gmra.mxu2 %vm1862_vm15, %v1839_v32 }
 0x1f8   : > { %2747 = vmatmul.msk.bf16.gmra.mxu3 %vm1862_vm15, %v1839_v32 }
 0x1f9   : > { %v2285_v25 = vpack.c.bf16 %v2254_v18, %v2253_v52 }
 0x1fa   : > { %v2022_v3 = vpop.f32.mrf.mxu2 }
 0x1fb   : > { %v2114_v58 = vpop.f32.mrf.mxu3  ;;  %2754 = vmatmul.msk.bf16.vlgmr.msrb.gmra.mxu0 %vm1778_vm13, %v2285_v25  ;;  %v1626_v25 = vpop.permute.xlu1 %1625 }
 0x1fc   : > { %v1920_v9 = vpop.f32.mrf.mxu1  ;;  %v2191_v11 = vadd.f32 %v2114_v58, %v2013_v50  ;;  %v1808_v50 = vsel %vm1778_vm13, %v3833_v31, %v1626_v25 }
 0x1fd   : > { %v2020_v4 = vadd.f32 %v2019_v15, %v1920_v9 }
 0x1fe   : > { %v2223_v6 = vmax.f32 %v2191_v11, 0.0 }
 0x200   : > { %v2255_v54 = vmul.f32 1.7139589, %v2223_v6  ;;  %v1845_v6 = vsel %vm1815_vm14, %v1808_v50, %v1771_v60 }
 0x202   : > { %v2024_v35 = vpop.f32.mrf.mxu2 }
 0x203   : > { %v2116_v22 = vpop.f32.mrf.mxu3 }
 0x204   : > { %v2192_v28 = vadd.f32 %v2116_v22, %v2015_v12  ;;  %v1923_v36 = vpop.f32.mrf.mxu1 }
 0x205   : > { %v2023_v18 = vadd.f32 %v2022_v3, %v1923_v36 }
 0x206   : > { %v2224_v21 = vmax.f32 %v2192_v28, 0.0 }
 0x207   : > { %2707 = vmatmul.msk.bf16.gmra.mxu1 %vm1862_vm15, %v1841_v63  ;;  %2728 = vmatmul.msk.bf16.gmra.mxu2 %vm1862_vm15, %v1841_v63 }
 0x208   : > { %v2256_v62 = vmul.f32 1.7139589, %v2224_v21  ;;  %2748 = vmatmul.msk.bf16.gmra.mxu3 %vm1862_vm15, %v1841_v63 }
 0x20a   : > { %v2027_v34 = vpop.f32.mrf.mxu2  ;;  %v2286_v24 = vpack.c.bf16 %v2256_v62, %v2255_v54  ;;  %v1628_v54 = vpop.permute.xlu0 %1627 }
 0x20b   : > { %v2119_v43 = vpop.f32.mrf.mxu3 }
 0x20c   : > { %2755 = vmatmul.msk.bf16.gmra.mxu0 %vm1778_vm13, %v2286_v24  ;;  %v1925_v42 = vpop.f32.mrf.mxu1  ;;  %v2193_v51 = vadd.f32 %v2119_v43, %v2018_v46  ;;  %v1773_v46 = vpop.permute.xlu1 %1772 }
 0x20d   : > { %v2025_v58 = vadd.f32 %v2024_v35, %v1925_v42  ;;  %v1810_v42 = vsel %vm1778_vm13, %v3854_v29, %v1628_v54 }
 0x20e   : > { %v2225_v23 = vmax.f32 %v2193_v51, 0.0 }
 0x210   : > { %v2257_v53 = vmul.f32 1.7139589, %v2225_v23 }
 0x212   : > { %v2029_v26 = vpop.f32.mrf.mxu2 }
 0x213   : > { %v2121_v49 = vpop.f32.mrf.mxu3 }
 0x214   : > { %v2194_v44 = vadd.f32 %v2121_v49, %v2020_v4  ;;  %v1928_v10 = vpop.f32.mrf.mxu1  ;;  %v1847_v49 = vsel %vm1815_vm14, %v1810_v42, %v1773_v46 }
 0x215   : > { %v2028_v63 = vadd.f32 %v2027_v34, %v1928_v10 }
 0x216   : > { %v2226_v39 = vmax.f32 %v2194_v44, 0.0 }
 0x217   : > { %2708 = vmatmul.msk.bf16.gmra.mxu1 %vm1862_vm15, %v1843_v8  ;;  %2729 = vmatmul.msk.bf16.gmra.mxu2 %vm1862_vm15, %v1843_v8 }
 0x218   : > { %v2258_v40 = vmul.f32 1.7139589, %v2226_v39  ;;  %2749 = vmatmul.msk.bf16.gmra.mxu3 %vm1862_vm15, %v1843_v8  ;;  %v1630_v39 = vpop.permute.xlu2 %1629 }
 0x21a   : > { %v2032_v15 = vpop.f32.mrf.mxu2  ;;  %v2287_v37 = vpack.c.bf16 %v2258_v40, %v2257_v53 }
 0x21b   : > { %v2124_v32 = vpop.f32.mrf.mxu3 }
 0x21c   : > { %2756 = vmatmul.msk.bf16.gmra.mxu0 %vm1778_vm13, %v2287_v37  ;;  %v1930_v52 = vpop.f32.mrf.mxu1  ;;  %v2195_v19 = vadd.f32 %v2124_v32, %v2023_v18  ;;  %v1812_v32 = vsel %vm1778_vm13, %v3882_v27, %v1630_v39 }
 0x21d   : > { %v2030_v24 = vadd.f32 %v2029_v26, %v1930_v52  ;;  %v1775_v52 = vpop.permute.xlu0 %1774 }
 0x21e   : > { %v2227_v12 = vmax.f32 %v2195_v19, 0.0  ;;  %v1849_v50 = vsel %vm1815_vm14, %v1812_v32, %v1775_v52 }
 0x220   : > { %v2259_v3 = vmul.f32 1.7139589, %v2227_v12 }
 0x222   : > { %v2034_v9 = vpop.f32.mrf.mxu2 }
 0x223   : > { %v2126_v11 = vpop.f32.mrf.mxu3 }
 0x224   : > { %v2196_v57 = vadd.f32 %v2126_v11, %v2025_v58  ;;  %v1933_v22 = vpop.f32.mrf.mxu1 }
 0x225   : > { %v2033_v8 = vadd.f32 %v2032_v15, %v1933_v22 }
 0x226   : > { %v2228_v28 = vmax.f32 %v2196_v57, 0.0 }
 0x227   : > { %2709 = vmatmul.msk.bf16.gmra.mxu1 %vm1862_vm15, %v1845_v6  ;;  %2730 = vmatmul.msk.bf16.gmra.mxu2 %vm1862_vm15, %v1845_v6 }
 0x228   : > { %v2260_v36 = vmul.f32 1.7139589, %v2228_v28  ;;  %2750 = vmatmul.msk.bf16.gmra.mxu3 %vm1862_vm15, %v1845_v6  ;;  %v1632_v6 = vpop.permute.xlu1 %1631 }
 0x22a   : > { %v2037_v35 = vpop.f32.mrf.mxu2  ;;  %v2288_v5 = vpack.c.bf16 %v2260_v36, %v2259_v3  ;;  %v1814_v36 = vsel %vm1778_vm13, %v3934_v41, %v1632_v6 }
 0x22b   : > { %v2129_v21 = vpop.f32.mrf.mxu3 }
 0x22c   : > { %2757 = vmatmul.msk.bf16.gmra.mxu0 %vm1778_vm13, %v2288_v5  ;;  %v1935_v31 = vpop.f32.mrf.mxu1  ;;  %v2197_v62 = vadd.f32 %v2129_v21, %v2028_v63  ;;  %v1777_v5 = vpop.permute.xlu2 %1776 }
 0x22d   : > { %v2035_v40 = vadd.f32 %v2034_v9, %v1935_v31 }
 0x22e   : > { %v2229_v0 = vmax.f32 %v2197_v62, 0.0 }
 0x230   : > { %v2261_v34 = vmul.f32 1.7139589, %v2229_v0 }
 0x232   : > { %v2039_v43 = vpop.f32.mrf.mxu2 }
 0x233   : > { %v2131_v51 = vpop.f32.mrf.mxu3 }
 0x234   : > { %v2198_v4 = vadd.f32 %v2131_v51, %v2030_v24  ;;  %v1938_v14 = vpop.f32.mrf.mxu1  ;;  %v1851_v24 = vsel %vm1815_vm14, %v1814_v36, %v1777_v5 }
 0x235   : > { %v2038_v22 = vadd.f32 %v2037_v35, %v1938_v14 }
 0x236   : > { %v2230_v23 = vmax.f32 %v2198_v4, 0.0 }
 0x237   : > { %2710 = vmatmul.msk.bf16.gmra.mxu1 %vm1862_vm15, %v1847_v49  ;;  %2731 = vmatmul.msk.bf16.gmra.mxu2 %vm1862_vm15, %v1847_v49 }
 0x238   : > { %v2262_v44 = vmul.f32 1.7139589, %v2230_v23  ;;  %2751 = vmatmul.msk.bf16.gmra.mxu3 %vm1862_vm15, %v1847_v49 }
 0x23a   : > { %v2289_v26 = vpack.c.bf16 %v2262_v44, %v2261_v34  ;;  %v2042_v10 = vpop.f32.mrf.mxu2 }
 0x23b   : > { %v2134_v59 = vpop.f32.mrf.mxu3 }
 0x23c   : > { %2758 = vmatmul.msk.bf16.gmra.mxu0 %vm1778_vm13, %v2289_v26  ;;  %v1940_v29 = vpop.f32.mrf.mxu1  ;;  %v2199_v53 = vadd.f32 %v2134_v59, %v2033_v8 }
 0x23d   : > { %v2040_v3 = vadd.f32 %v2039_v43, %v1940_v29 }
 0x23e   : > { %v2231_v25 = vmax.f32 %v2199_v53, 0.0 }
 0x240   : > { %v2263_v11 = vmul.f32 1.7139589, %v2231_v25 }
 0x242   : > { %v2044_v37 = vpop.f32.mrf.mxu2 }
 0x243   : > { %v2136_v18 = vpop.f32.mrf.mxu3 }
 0x244   : > { %v2200_v19 = vadd.f32 %v2136_v18, %v2035_v40  ;;  %v1943_v58 = vpop.f32.mrf.mxu1 }
 0x245   : > { %v2043_v4 = vadd.f32 %v2042_v10, %v1943_v58 }
 0x246   : > { %v2232_v60 = vmax.f32 %v2200_v19, 0.0 }
 0x247   : > { %2711 = vmatmul.msk.bf16.gmra.mxu1 %vm1862_vm15, %v1849_v50 }
 0x248   : > { %v2264_v12 = vmul.f32 1.7139589, %v2232_v60  ;;  %2752 = vmatmul.msk.bf16.gmra.mxu3 %vm1862_vm15, %v1849_v50 }
 0x24a   : > { %v2290_v15 = vpack.c.bf16 %v2264_v12, %v2263_v11  ;;  %v2047_v9 = vpop.f32.mrf.mxu2 }
 0x24b   : > { %v2139_v57 = vpop.f32.mrf.mxu3 }
 0x24c   : > { %2759 = vmatmul.msk.bf16.gmra.mxu0 %vm1778_vm13, %v2290_v15  ;;  %v1945_v27 = vpop.f32.mrf.mxu1  ;;  %v2201_v28 = vadd.f32 %v2139_v57, %v2038_v22  ;;  %v4232_v22 = vunpack.c.l.bf16 %v3246_v1 }
 0x24d   : > { %v2045_v49 = vadd.f32 %v2044_v37, %v1945_v27 }
 0x24e   : > { %v2233_v31 = vmax.f32 %v2201_v28, 0.0 }
 0x250   : > { %v2265_v46 = vmul.f32 1.7139589, %v2233_v31 }
 0x252   : > { %v2049_v62 = vpop.f32.mrf.mxu2 }
 0x253   : > { %v2141_v21 = vpop.f32.mrf.mxu3 }
 0x254   : > { %v2202_v63 = vadd.f32 %v2141_v21, %v2040_v3  ;;  %v1948_v54 = vpop.f32.mrf.mxu1 }
 0x255   : > { %v2048_v52 = vadd.f32 %v2047_v9, %v1948_v54 }
 0x256   : > { %v2234_v42 = vmax.f32 %v2202_v63, 0.0 }
 0x258   : > { %v2266_v51 = vmul.f32 1.7139589, %v2234_v42  ;;  %2753 = vmatmul.msk.bf16.gmra.mxu3 %vm1862_vm15, %v1851_v24 }
 0x25a   : > { %v2291_v35 = vpack.c.bf16 %v2266_v51, %v2265_v46  ;;  %v2052_v41 = vpop.f32.mrf.mxu2 }
 0x25b   : > { %v2144_v0 = vpop.f32.mrf.mxu3 }
 0x25c   : > { %2760 = vmatmul.msk.bf16.gmra.mxu0 %vm1778_vm13, %v2291_v35  ;;  %v1950_v43 = vpop.f32.mrf.mxu1  ;;  %v2203_v14 = vadd.f32 %v2144_v0, %v2043_v4 }
 0x25d   : > { %v2050_v25 = vadd.f32 %v2049_v62, %v1950_v43  ;;  %v4233_v62 = vunpack.c.h.bf16 %v3246_v1 }
 0x25e   : > { %v2235_v34 = vmax.f32 %v2203_v14, 0.0 }
 0x260   : > { %v2267_v29 = vmul.f32 1.7139589, %v2235_v34 }
 0x262   : > { %v2054_v39 = vpop.f32.mrf.mxu2 }
 0x263   : > { %v2146_v23 = vpop.f32.mrf.mxu3 }
 0x264   : > { %v2204_v44 = vadd.f32 %v2146_v23, %v2045_v49  ;;  %v1953_v26 = vpop.f32.mrf.mxu1 }
 0x265   : > { %v2053_v5 = vadd.f32 %v2052_v41, %v1953_v26  ;;  %v4234_v26 = vunpack.c.l.bf16 %v3268_v17 }
 0x266   : > { %v2236_v59 = vmax.f32 %v2204_v44, 0.0 }
 0x268   : > { %v2268_v8 = vmul.f32 1.7139589, %v2236_v59 }
 0x26a   : > { %v2292_v53 = vpack.c.bf16 %v2268_v8, %v2267_v29  ;;  %v2057_v10 = vpop.f32.mrf.mxu2 }
 0x26b   : > { %v2149_v40 = vpop.f32.mrf.mxu3 }
 0x26c   : > { %2761 = vmatmul.msk.bf16.gmra.mxu0 %vm1778_vm13, %v2292_v53  ;;  %v1955_v32 = vpop.f32.mrf.mxu1  ;;  %v2205_v18 = vadd.f32 %v2149_v40, %v2048_v52 }
 0x26d   : > { %v2055_v54 = vadd.f32 %v2054_v39, %v1955_v32 }
 0x26e   : > { %v2237_v58 = vmax.f32 %v2205_v18, 0.0 }
 0x270   : > { %v2269_v11 = vmul.f32 1.7139589, %v2237_v58 }
 0x272   : > { %v2059_v3 = vpop.f32.mrf.mxu2 }
 0x273   : > { %v2151_v19 = vpop.f32.mrf.mxu3 }
 0x274   : > { %v2206_v37 = vadd.f32 %v2151_v19, %v2050_v25  ;;  %v1958_v50 = vpop.f32.mrf.mxu1  ;;  %v4235_v19 = vunpack.c.h.bf16 %v3268_v17 }
 0x275   : > { %v2058_v59 = vadd.f32 %v2057_v10, %v1958_v50 }
 0x276   : > { %v2238_v60 = vmax.f32 %v2206_v37, 0.0 }
 0x278   : > { %v2270_v12 = vmul.f32 1.7139589, %v2238_v60  ;;  %v2363_v15 = vpop.f32.mrf.mxu0 }
 0x279   : > { %v2443_v57 = vmul.f32 0.2, %v2363_v15 }
 0x27a   : > { %v2293_v27 = vpack.c.bf16 %v2270_v12, %v2269_v11  ;;  %v2062_v4 = vpop.f32.mrf.mxu2 }
 0x27b   : > { %v2475_v6 = vadd.f32 %v4232_v22, %v2443_v57  ;;  %v2154_v28 = vpop.f32.mrf.mxu3 }
 0x27c   : > { %2762 = vmatmul.msk.bf16.gmra.mxu0 %vm1778_vm13, %v2293_v27  ;;  %v1960_v9 = vpop.f32.mrf.mxu1  ;;  %v2207_v21 = vadd.f32 %v2154_v28, %v2053_v5  ;;  %v4236_v28 = vunpack.c.l.bf16 %v3303_v45 }
 0x27d   : > { %v2507_v36 = vpack.c.bf16 %v2475_v6, %v2475_v6  ;;  %v2060_v32 = vadd.f32 %v2059_v3, %v1960_v9 }
 0x27e   : > { %v2239_v46 = vmax.f32 %v2207_v21, 0.0 }
 0x27f   : > { %2540 = vst.msk [vmem:[%s4012_s12] sm:$0xf] %vm2539_vm1, %v2507_v36 }
 0x280   : > { %v2365_v31 = vpop.f32.mrf.mxu0  ;;  %v2271_v41 = vmul.f32 1.7139589, %v2239_v46 }
 0x281   : > { %v2444_v63 = vmul.f32 0.2, %v2365_v31 }
 0x282   : > { %v2064_v53 = vpop.f32.mrf.mxu2 }
 0x283   : > { %v2476_v24 = vadd.f32 %v4233_v62, %v2444_v63  ;;  %v2156_v42 = vpop.f32.mrf.mxu3 }
 0x284   : > { %v2208_v51 = vadd.f32 %v2156_v42, %v2055_v54  ;;  %v1963_v0 = vpop.f32.mrf.mxu1 }
 0x285   : > { %v2508_v35 = vpack.c.bf16 %v2476_v24, %v2476_v24  ;;  %v2063_v17 = vadd.f32 %v2062_v4, %v1963_v0  ;;  %v4237_v24 = vunpack.c.h.bf16 %v3303_v45 }
 0x286   : > { %v2240_v43 = vmax.f32 %v2208_v51, 0.0 }
 0x287   : > { %2541 = vst.msk [vmem:[%s4012_s12 + $0x4] sm:$0xf] %vm2539_vm1, %v2508_v35 }
 0x288   : > { %v2272_v14 = vmul.f32 1.7139589, %v2240_v43 }
 0x289   : > { %v2368_v49 = vpop.f32.mrf.mxu0 }
 0x28a   : > { %v2294_v23 = vpack.c.bf16 %v2272_v14, %v2271_v41  ;;  %v2445_v34 = vmul.f32 0.2, %v2368_v49  ;;  %v2067_v22 = vpop.f32.mrf.mxu2 }
 0x28b   : > { %v2159_v44 = vpop.f32.mrf.mxu3 }
 0x28c   : > { %v2477_v1 = vadd.f32 %v4234_v26, %v2445_v34  ;;  %2763 = vmatmul.msk.bf16.gmra.mxu0 %vm1778_vm13, %v2294_v23  ;;  %v1965_v8 = vpop.f32.mrf.mxu1  ;;  %v2209_v39 = vadd.f32 %v2159_v44, %v2058_v59  ;;  %v4238_v34 = vunpack.c.l.bf16 %v3348_v33 }
 0x28d   : > { %v2065_v21 = vadd.f32 %v2064_v53, %v1965_v8 }
 0x28e   : > { %v2509_v29 = vpack.c.bf16 %v2477_v1, %v2477_v1  ;;  %v2241_v25 = vmax.f32 %v2209_v39, 0.0 }
 0x290   : > { %2542 = vst.msk [vmem:[%s4012_s12 + $0x8] sm:$0xf] %vm2539_vm1, %v2509_v29  ;;  %v2273_v10 = vmul.f32 1.7139589, %v2241_v25 }
 0x291   : > { %v2370_v40 = vpop.f32.mrf.mxu0 }
 0x292   : > { %v2446_v52 = vmul.f32 0.2, %v2370_v40  ;;  %v2069_v51 = vpop.f32.mrf.mxu2 }
 0x293   : > { %v2161_v18 = vpop.f32.mrf.mxu3 }
 0x294   : > { %v2478_v58 = vadd.f32 %v4235_v19, %v2446_v52  ;;  %v2210_v37 = vadd.f32 %v2161_v18, %v2060_v32  ;;  %v1968_v12 = vpop.f32.mrf.mxu1  ;;  %v4239_v52 = vunpack.c.h.bf16 %v3348_v33 }
 0x295   : > { %v2068_v26 = vadd.f32 %v2067_v22, %v1968_v12 }
 0x296   : > { %v2510_v60 = vpack.c.bf16 %v2478_v58, %v2478_v58  ;;  %v2242_v11 = vmax.f32 %v2210_v37, 0.0 }
 0x298   : > { %2543 = vst.msk [vmem:[%s4012_s12 + $0xc] sm:$0xf] %vm2539_vm1, %v2510_v60  ;;  %v2274_v50 = vmul.f32 1.7139589, %v2242_v11 }
 0x299   : > { %v2373_v15 = vpop.f32.mrf.mxu0 }
 0x29a   : > { %v2295_v57 = vpack.c.bf16 %v2274_v50, %v2273_v10  ;;  %v2447_v27 = vmul.f32 0.2, %v2373_v15  ;;  %v2072_v59 = vpop.f32.mrf.mxu2 }
 0x29b   : > { %v2164_v6 = vpop.f32.mrf.mxu3 }
 0x29c   : > { %v2479_v9 = vadd.f32 %v4236_v28, %v2447_v27  ;;  %2764 = vmatmul.msk.bf16.gmra.mxu0 %vm1778_vm13, %v2295_v57  ;;  %v2211_v36 = vadd.f32 %v2164_v6, %v2063_v17  ;;  %v1970_v63 = vpop.f32.mrf.mxu1  ;;  %v4240_v27 = vunpack.c.l.bf16 %v3249_v2 }
 0x29d   : > { %v2070_v39 = vadd.f32 %v2069_v51, %v1970_v63  ;;  %v4241_v63 = vunpack.c.h.bf16 %v3249_v2 }
 0x29e   : > { %v2511_v3 = vpack.c.bf16 %v2479_v9, %v2479_v9  ;;  %v2243_v62 = vmax.f32 %v2211_v36, 0.0 }
 0x2a0   : > { %2544 = vst.msk [vmem:[%s4012_s12 + $0x10] sm:$0xf] %vm2539_vm1, %v2511_v3  ;;  %v2275_v0 = vmul.f32 1.7139589, %v2243_v62 }
 0x2a1   : > { %v2375_v5 = vpop.f32.mrf.mxu0 }
 0x2a2   : > { %v2448_v31 = vmul.f32 0.2, %v2375_v5  ;;  %v2074_v10 = vpop.f32.mrf.mxu2 }
 0x2a3   : > { %v2166_v54 = vpop.f32.mrf.mxu3 }
 0x2a4   : > { %v2480_v42 = vadd.f32 %v4237_v24, %v2448_v31  ;;  %v2212_v46 = vadd.f32 %v2166_v54, %v2065_v21  ;;  %v1973_v45 = vpop.f32.mrf.mxu1 }
 0x2a5   : > { %v2073_v33 = vadd.f32 %v2072_v59, %v1973_v45 }
 0x2a6   : > { %v2512_v35 = vpack.c.bf16 %v2480_v42, %v2480_v42  ;;  %v2244_v43 = vmax.f32 %v2212_v46, 0.0 }
 0x2a8   : > { %2545 = vst.msk [vmem:[%s4012_s12 + $0x14] sm:$0xf] %vm2539_vm1, %v2512_v35  ;;  %v2276_v4 = vmul.f32 1.7139589, %v2244_v43 }
 0x2a9   : > { %v2378_v41 = vpop.f32.mrf.mxu0 }
 0x2aa   : > { %v2296_v14 = vpack.c.bf16 %v2276_v4, %v2275_v0  ;;  %v2449_v49 = vmul.f32 0.2, %v2378_v41  ;;  %v2077_v5 = vpop.f32.mrf.mxu2 }
 0x2ab   : > { %v2169_v23 = vpop.f32.mrf.mxu3 }
 0x2ac   : > { %v2481_v44 = vadd.f32 %v4238_v34, %v2449_v49  ;;  %2765 = vmatmul.msk.bf16.gmra.mxu0 %vm1778_vm13, %v2296_v14  ;;  %v2213_v29 = vadd.f32 %v2169_v23, %v2068_v26  ;;  %v1975_v37 = vpop.f32.mrf.mxu1  ;;  %v4242_v14 = vunpack.c.l.bf16 %v3272_v20 }
 0x2ad   : > { %v2075_v3 = vadd.f32 %v2074_v10, %v1975_v37  ;;  %v4244_v10 = vunpack.c.l.bf16 %v3306_v47 }
 0x2ae   : > { %v2513_v1 = vpack.c.bf16 %v2481_v44, %v2481_v44  ;;  %v2245_v32 = vmax.f32 %v2213_v29, 0.0 }
 0x2b0   : > { %2546 = vst.msk [vmem:[%s4012_s12 + $0x18] sm:$0xf] %vm2539_vm1, %v2513_v1  ;;  %v2277_v60 = vmul.f32 1.7139589, %v2245_v32 }
 0x2b1   : > { %v2380_v8 = vpop.f32.mrf.mxu0 }
 0x2b2   : > { %v2450_v53 = vmul.f32 0.2, %v2380_v8  ;;  %v2079_v2 = vpop.f32.mrf.mxu2  ;;  %v4243_v8 = vunpack.c.h.bf16 %v3272_v20 }
 0x2b3   : > { %v2171_v40 = vpop.f32.mrf.mxu3 }
 0x2b4   : > { %v2482_v18 = vadd.f32 %v4239_v52, %v2450_v53  ;;  %v2214_v25 = vadd.f32 %v2171_v40, %v2070_v39  ;;  %v1978_v9 = vpop.f32.mrf.mxu1 }
 0x2b5   : > { %v2078_v23 = vadd.f32 %v2077_v5, %v1978_v9 }
 0x2b6   : > { %v2514_v19 = vpack.c.bf16 %v2482_v18, %v2482_v18  ;;  %v2246_v58 = vmax.f32 %v2214_v25, 0.0 }
 0x2b8   : > { %2547 = vst.msk [vmem:[%s4012_s12 + $0x1c] sm:$0xf] %vm2539_vm1, %v2514_v19  ;;  %v2278_v11 = vmul.f32 1.7139589, %v2246_v58 }
 0x2b9   : > { %v2383_v50 = vpop.f32.mrf.mxu0 }
 0x2ba   : > { %v2297_v12 = vpack.c.bf16 %v2278_v11, %v2277_v60  ;;  %v2451_v15 = vmul.f32 0.2, %v2383_v50  ;;  %v2082_v18 = vpop.f32.mrf.mxu2 }
 0x2bb   : > { %v2174_v57 = vpop.f32.mrf.mxu3 }
 0x2bc   : > { %v2483_v22 = vadd.f32 %v4240_v27, %v2451_v15  ;;  %2766 = vmatmul.msk.bf16.gmra.mxu0 %vm1778_vm13, %v2297_v12  ;;  %v2215_v28 = vadd.f32 %v2174_v57, %v2073_v33  ;;  %v1980_v4 = vpop.f32.mrf.mxu1 }
 0x2bd   : > { %v2080_v26 = vadd.f32 %v2079_v2, %v1980_v4 }
 0x2be   : > { %v2515_v6 = vpack.c.bf16 %v2483_v22, %v2483_v22  ;;  %v2247_v31 = vmax.f32 %v2215_v28, 0.0 }
 0x2c0   : > { %2548 = vst.msk [vmem:[%s4012_s12 + $0x20] sm:$0xf] %vm2539_vm1, %v2515_v6  ;;  %v2279_v46 = vmul.f32 1.7139589, %v2247_v31 }
 0x2c1   : > { %v2385_v17 = vpop.f32.mrf.mxu0 }
 0x2c2   : > { %v2452_v36 = vmul.f32 0.2, %v2385_v17  ;;  %v2084_v27 = vpop.f32.mrf.mxu2  ;;  %v4245_v17 = vunpack.c.h.bf16 %v3306_v47 }
 0x2c3   : > { %v2176_v21 = vpop.f32.mrf.mxu3 }
 0x2c4   : > { %v2484_v54 = vadd.f32 %v4241_v63, %v2452_v36  ;;  %v2216_v62 = vadd.f32 %v2176_v21, %v2075_v3  ;;  %v1983_v40 = vpop.f32.mrf.mxu1 }
 0x2c5   : > { %v2083_v20 = vadd.f32 %v2082_v18, %v1983_v40 }
 0x2c6   : > { %v2516_v24 = vpack.c.bf16 %v2484_v54, %v2484_v54  ;;  %v2248_v42 = vmax.f32 %v2216_v62, 0.0 }
 0x2c8   : > { %2549 = vst.msk [vmem:[%s4012_s12 + $0x24] sm:$0xf] %vm2539_vm1, %v2516_v24  ;;  %v2280_v51 = vmul.f32 1.7139589, %v2248_v42  ;;  %v4246_v42 = vunpack.c.l.bf16 %v3351_v38 }
 0x2c9   : > { %v2388_v35 = vpop.f32.mrf.mxu0 }
 0x2ca   : > { %v2298_v43 = vpack.c.bf16 %v2280_v51, %v2279_v46  ;;  %v2453_v0 = vmul.f32 0.2, %v2388_v35 }
 0x2cb   : > { %v2179_v41 = vpop.f32.mrf.mxu3 }
 0x2cc   : > { %v2485_v49 = vadd.f32 %v4242_v14, %v2453_v0  ;;  %2767 = vmatmul.msk.bf16.gmra.mxu0 %vm1778_vm13, %v2298_v43  ;;  %v2217_v44 = vadd.f32 %v2179_v41, %v2078_v23  ;;  %v1985_v15 = vpop.f32.mrf.mxu1  ;;  %v4247_v43 = vunpack.c.h.bf16 %v3351_v38 }
 0x2cd   : > { %v2085_v33 = vadd.f32 %v2084_v27, %v1985_v15  ;;  %v4254_v15 = vunpack.c.l.bf16 %v3364_v48 }
 0x2ce   : > { %v2517_v34 = vpack.c.bf16 %v2485_v49, %v2485_v49  ;;  %v2249_v29 = vmax.f32 %v2217_v44, 0.0  ;;  %v4248_v49 = vunpack.c.l.bf16 %v3256_v7 }
 0x2d0   : > { %2550 = vst.msk [vmem:[%s4012_s12 + $0x28] sm:$0xf] %vm2539_vm1, %v2517_v34  ;;  %v2281_v25 = vmul.f32 1.7139589, %v2249_v29  ;;  %v4250_v29 = vunpack.c.l.bf16 %v3285_v30 }
 0x2d1   : > { %v2390_v45 = vpop.f32.mrf.mxu0 }
 0x2d2   : > { %v2454_v1 = vmul.f32 0.2, %v2390_v45  ;;  %v4249_v45 = vunpack.c.h.bf16 %v3256_v7 }
 0x2d3   : > { %v2181_v59 = vpop.f32.mrf.mxu3 }
 0x2d4   : > { %v2486_v39 = vadd.f32 %v4243_v8, %v2454_v1  ;;  %v2218_v53 = vadd.f32 %v2181_v59, %v2080_v26 }
 0x2d6   : > { %v2518_v32 = vpack.c.bf16 %v2486_v39, %v2486_v39  ;;  %v2250_v52 = vmax.f32 %v2218_v53, 0.0 }
 0x2d8   : > { %2551 = vst.msk [vmem:[%s4012_s12 + $0x2c] sm:$0xf] %vm2539_vm1, %v2518_v32  ;;  %v2282_v19 = vmul.f32 1.7139589, %v2250_v52  ;;  %v4251_v32 = vunpack.c.h.bf16 %v3285_v30 }
 0x2d9   : > { %v2393_v58 = vpop.f32.mrf.mxu0 }
 0x2da   : > { %v2299_v37 = vpack.c.bf16 %v2282_v19, %v2281_v25  ;;  %v2455_v60 = vmul.f32 0.2, %v2393_v58  ;;  %v4252_v19 = vunpack.c.l.bf16 %v3318_v56 }
 0x2db   : > { %v2184_v11 = vpop.f32.mrf.mxu3 }
 0x2dc   : > { %v2487_v50 = vadd.f32 %v4244_v10, %v2455_v60  ;;  %2768 = vmatmul.msk.bf16.gmra.mxu0 %vm1778_vm13, %v2299_v37  ;;  %v2219_v57 = vadd.f32 %v2184_v11, %v2083_v20  ;;  %v4253_v10 = vunpack.c.h.bf16 %v3318_v56 }
 0x2de   : > { %v2519_v12 = vpack.c.bf16 %v2487_v50, %v2487_v50  ;;  %v2251_v9 = vmax.f32 %v2219_v57, 0.0 }
 0x2e0   : > { %2552 = vst.msk [vmem:[%s4012_s12 + $0x30] sm:$0xf] %vm2539_vm1, %v2519_v12  ;;  %v2283_v31 = vmul.f32 1.7139589, %v2251_v9 }
 0x2e1   : > { %v2395_v22 = vpop.f32.mrf.mxu0 }
 0x2e2   : > { %v2456_v6 = vmul.f32 0.2, %v2395_v22 }
 0x2e3   : > { %v2186_v28 = vpop.f32.mrf.mxu3 }
 0x2e4   : > { %v2488_v3 = vadd.f32 %v4245_v17, %v2456_v6  ;;  %v2220_v36 = vadd.f32 %v2186_v28, %v2085_v33  ;;  %v4255_v6 = vunpack.c.h.bf16 %v3364_v48 }
 0x2e6   : > { %v2520_v5 = vpack.c.bf16 %v2488_v3, %v2488_v3  ;;  %v2252_v21 = vmax.f32 %v2220_v36, 0.0  ;;  %v4256_v3 = vunpack.c.l.bf16 %v3315_v55 }
 0x2e8   : > { %2553 = vst.msk [vmem:[%s4012_s12 + $0x34] sm:$0xf] %vm2539_vm1, %v2520_v5  ;;  %v2284_v63 = vmul.f32 1.7139589, %v2252_v21 }
 0x2e9   : > { %v2398_v54 = vpop.f32.mrf.mxu0 }
 0x2ea   : > { %v2300_v62 = vpack.c.bf16 %v2284_v63, %v2283_v31  ;;  %v2457_v24 = vmul.f32 0.2, %v2398_v54  ;;  %v4257_v63 = vunpack.c.h.bf16 %v3315_v55 }
 0x2ec   : > { %v2489_v46 = vadd.f32 %v4246_v42, %v2457_v24  ;;  %2769 = vmatmul.msk.bf16.gmra.mxu0 %vm1778_vm13, %v2300_v62  ;;  %v4258_v42 = vunpack.c.l.bf16 %v3338_v16 }
 0x2ee   : > { %v2521_v51 = vpack.c.bf16 %v2489_v46, %v2489_v46 }
 0x2f0   : > { %2554 = vst.msk [vmem:[%s4012_s12 + $0x38] sm:$0xf] %vm2539_vm1, %v2521_v51 }
 0x2f1   : > { %v2400_v47 = vpop.f32.mrf.mxu0 }
 0x2f2   : > { %v2458_v35 = vmul.f32 0.2, %v2400_v47 }
 0x2f4   : > { %v2490_v0 = vadd.f32 %v4247_v43, %v2458_v35  ;;  %v4259_v43 = vunpack.c.h.bf16 %v3338_v16 }
 0x2f6   : > { %v2522_v4 = vpack.c.bf16 %v2490_v0, %v2490_v0 }
 0x2f8   : > { %2555 = vst.msk [vmem:[%s4012_s12 + $0x3c] sm:$0xf] %vm2539_vm1, %v2522_v4 }
 0x2f9   : > { %v2403_v41 = vpop.f32.mrf.mxu0 }
 0x2fa   : > { %v2459_v14 = vmul.f32 0.2, %v2403_v41 }
 0x2fc   : > { %v2491_v2 = vadd.f32 %v4248_v49, %v2459_v14  ;;  %v4260_v14 = vunpack.c.l.bf16 %v3378_v13 }
 0x2fe   : > { %v2523_v23 = vpack.c.bf16 %v2491_v2, %v2491_v2 }
 0x300   : > { %2556 = vst.msk [vmem:[%s4012_s12 + $0x40] sm:$0xf] %vm2539_vm1, %v2523_v23 }
 0x301   : > { %v2405_v34 = vpop.f32.mrf.mxu0 }
 0x302   : > { %v2460_v44 = vmul.f32 0.2, %v2405_v34 }
 0x304   : > { %v2492_v26 = vadd.f32 %v4249_v45, %v2460_v44  ;;  %v4261_v44 = vunpack.c.h.bf16 %v3378_v13 }
 0x306   : > { %v2524_v38 = vpack.c.bf16 %v2492_v26, %v2492_v26 }
 0x308   : > { %2557 = vst.msk [vmem:[%s4012_s12 + $0x44] sm:$0xf] %vm2539_vm1, %v2524_v38 }
 0x309   : > { %v2408_v1 = vpop.f32.mrf.mxu0 }
 0x30a   : > { %v2461_v59 = vmul.f32 0.2, %v2408_v1  ;;  %v4262_v1 = vunpack.c.l.bf16 %v3395_v61 }
 0x30c   : > { %v2493_v8 = vadd.f32 %v4250_v29, %v2461_v59 }
 0x30e   : > { %v2525_v39 = vpack.c.bf16 %v2493_v8, %v2493_v8 }
 0x310   : > { %2558 = vst.msk [vmem:[%s4012_s12 + $0x48] sm:$0xf] %vm2539_vm1, %v2525_v39  ;;  %v4263_v39 = vunpack.c.h.bf16 %v3395_v61 }
 0x311   : > { %v2410_v53 = vpop.f32.mrf.mxu0 }
 0x312   : > { %v2462_v40 = vmul.f32 0.2, %v2410_v53 }
 0x314   : > { %v2494_v52 = vadd.f32 %v4251_v32, %v2462_v40 }
 0x316   : > { %v2526_v7 = vpack.c.bf16 %v2494_v52, %v2494_v52 }
 0x318   : > { %2559 = vst.msk [vmem:[%s4012_s12 + $0x4c] sm:$0xf] %vm2539_vm1, %v2526_v7 }
 0x319   : > { %v2413_v18 = vpop.f32.mrf.mxu0 }
 0x31a   : > { %v2463_v25 = vmul.f32 0.2, %v2413_v18 }
 0x31c   : > { %v2495_v58 = vadd.f32 %v4252_v19, %v2463_v25 }
 0x31e   : > { %v2527_v37 = vpack.c.bf16 %v2495_v58, %v2495_v58 }
 0x320   : > { %2560 = vst.msk [vmem:[%s4012_s12 + $0x50] sm:$0xf] %vm2539_vm1, %v2527_v37 }
 0x321   : > { %v2415_v60 = vpop.f32.mrf.mxu0 }
 0x322   : > { %v2464_v11 = vmul.f32 0.2, %v2415_v60 }
 0x324   : > { %v2496_v50 = vadd.f32 %v4253_v10, %v2464_v11 }
 0x326   : > { %v2528_v30 = vpack.c.bf16 %v2496_v50, %v2496_v50 }
 0x328   : > { %2561 = vst.msk [vmem:[%s4012_s12 + $0x54] sm:$0xf] %vm2539_vm1, %v2528_v30 }
 0x329   : > { %v2418_v20 = vpop.f32.mrf.mxu0 }
 0x32a   : > { %v2465_v12 = vmul.f32 0.2, %v2418_v20 }
 0x32c   : > { %v2497_v57 = vadd.f32 %v4254_v15, %v2465_v12 }
 0x32e   : > { %v2529_v27 = vpack.c.bf16 %v2497_v57, %v2497_v57 }
 0x330   : > { %2562 = vst.msk [vmem:[%s4012_s12 + $0x58] sm:$0xf] %vm2539_vm1, %v2529_v27 }
 0x331   : > { %v2420_v22 = vpop.f32.mrf.mxu0 }
 0x332   : > { %v2466_v33 = vmul.f32 0.2, %v2420_v22 }
 0x334   : > { %v2498_v28 = vadd.f32 %v4255_v6, %v2466_v33 }
 0x336   : > { %v2530_v56 = vpack.c.bf16 %v2498_v28, %v2498_v28 }
 0x338   : > { %2563 = vst.msk [vmem:[%s4012_s12 + $0x5c] sm:$0xf] %vm2539_vm1, %v2530_v56 }
 0x339   : > { %v2423_v9 = vpop.f32.mrf.mxu0 }
 0x33a   : > { %v2467_v17 = vmul.f32 0.2, %v2423_v9 }
 0x33c   : > { %v2499_v36 = vadd.f32 %v4256_v3, %v2467_v17 }
 0x33e   : > { %v2531_v5 = vpack.c.bf16 %v2499_v36, %v2499_v36 }
 0x340   : > { %2564 = vst.msk [vmem:[%s4012_s12 + $0x60] sm:$0xf] %vm2539_vm1, %v2531_v5 }
 0x341   : > { %v2425_v21 = vpop.f32.mrf.mxu0 }
 0x342   : > { %v2468_v31 = vmul.f32 0.2, %v2425_v21 }
 0x344   : > { %v2500_v54 = vadd.f32 %v4257_v63, %v2468_v31 }
 0x346   : > { %v2532_v48 = vpack.c.bf16 %v2500_v54, %v2500_v54 }
 0x348   : > { %2565 = vst.msk [vmem:[%s4012_s12 + $0x64] sm:$0xf] %vm2539_vm1, %v2532_v48 }
 0x349   : > { %v2428_v62 = vpop.f32.mrf.mxu0 }
 0x34a   : > { %v2469_v24 = vmul.f32 0.2, %v2428_v62 }
 0x34c   : > { %v2501_v46 = vadd.f32 %v4258_v42, %v2469_v24 }
 0x34e   : > { %v2533_v51 = vpack.c.bf16 %v2501_v46, %v2501_v46 }
 0x350   : > { %2566 = vst.msk [vmem:[%s4012_s12 + $0x68] sm:$0xf] %vm2539_vm1, %v2533_v51 }
 0x351   : > { %v2430_v47 = vpop.f32.mrf.mxu0 }
 0x352   : > { %v2470_v35 = vmul.f32 0.2, %v2430_v47 }
 0x354   : > { %v2502_v0 = vadd.f32 %v4259_v43, %v2470_v35 }
 0x356   : > { %v2534_v55 = vpack.c.bf16 %v2502_v0, %v2502_v0 }
 0x358   : > { %2567 = vst.msk [vmem:[%s4012_s12 + $0x6c] sm:$0xf] %vm2539_vm1, %v2534_v55 }
 0x359   : > { %v2433_v4 = vpop.f32.mrf.mxu0 }
 0x35a   : > { %v2471_v41 = vmul.f32 0.2, %v2433_v4 }
 0x35c   : > { %v2503_v49 = vadd.f32 %v4260_v14, %v2471_v41 }
 0x35e   : > { %v2535_v2 = vpack.c.bf16 %v2503_v49, %v2503_v49 }
 0x360   : > { %2568 = vst.msk [vmem:[%s4012_s12 + $0x70] sm:$0xf] %vm2539_vm1, %v2535_v2 }
 0x361   : > { %v2435_v23 = vpop.f32.mrf.mxu0 }
 0x362   : > { %v2472_v34 = vmul.f32 0.2, %v2435_v23 }
 0x364   : > { %v2504_v16 = vadd.f32 %v4261_v44, %v2472_v34 }
 0x366   : > { %v2536_v45 = vpack.c.bf16 %v2504_v16, %v2504_v16 }
 0x368   : > { %2569 = vst.msk [vmem:[%s4012_s12 + $0x74] sm:$0xf] %vm2539_vm1, %v2536_v45 }
 0x369   : > { %v2438_v26 = vpop.f32.mrf.mxu0 }
 0x36a   : > { %v2473_v38 = vmul.f32 0.2, %v2438_v26 }
 0x36c   : > { %v2505_v59 = vadd.f32 %v4262_v1, %v2473_v38 }
 0x36e   : > { %v2537_v29 = vpack.c.bf16 %v2505_v59, %v2505_v59 }
 0x370   : > { %2570 = vst.msk [vmem:[%s4012_s12 + $0x78] sm:$0xf] %vm2539_vm1, %v2537_v29 }
 0x371   : > { %v2440_v13 = vpop.f32.mrf.mxu0 }
 0x372   : > { %v2474_v8 = vmul.f32 0.2, %v2440_v13 }
 0x374   : > { %v2506_v53 = vadd.f32 %v4263_v39, %v2474_v8 }
 0x376   : > { %v2538_v40 = vpack.c.bf16 %v2506_v53, %v2506_v53 }
 0x378   : > { %2571 = vst.msk [vmem:[%s4012_s12 + $0x7c] sm:$0xf] %vm2539_vm1, %v2538_v40 }
 0x379   : > { %3069 = shalt.err (!%p3066_p4)
}
 0x37a   : > { %s3118_s7 = smov 64  }
 0x37b   : > { %2936 = dma.vmem_to_hbm [thread:$0]  (%p3194_p11), %s2586_s25, 2048, %s2588_s30, %s2573_s19, %s3118_s7, %s3118_s7, %s3116_s26  }
 0x37c PF: > { %s2602_s13 = sand.u32 1, %s3099_s15   ;;  %p4264_p7 = scmp.ge.s32.totalorder %s3111_s18, 2 }
 0x37d   : > { %s2603_s12 = scalar_lea.sflag [#allocation5], %s2602_s13 }
 0x37e   : > { %p2943_p5 = pnand %p4264_p7, %p3198_p12 }
 0x380   : > { %p2944_p8 = pneg %p2943_p5 }
 0x382   : > { %3091 = dma.done.wait (%p2944_p8), %s2603_s12, 2048  }
 0x383   : > { %3093 = vsyncadd (%p2944_p8), %s2603_s12, 4294965248  ;;  %p17_p10 = scmp.ge.s32.totalorder %s3169_s21, 4   ;;  %s4265_s15 = smov %s3103_s16 }
 0x384   : > { %s4266_s16 = smov %s3107_s17  ;;  %s4267_s17 = smov %s3181_s24 }
 0x385   : > { %s4268_s18 = smov %s3169_s21  ;;  %19 = sbr.rel (!%p17_p10) target bundleno = 5 (0x5), region = 85 }
 0x38a   :  { %2609 = vsyncpa [#allocation4], 1 }
 0x38b   :  { %2611 = vsyncpa [#allocation4 + $0x1], 1 }
 0x38c   :  { %2612 = vsyncpa [#allocation5], 1 }
 0x38d   :  { %2614 = vsyncpa [#allocation5 + $0x1], 1 }

</bundles_post_ra>
